<compile_context>
chip_gen: v7x
topology: tpu7x:2x2x1
jax: 0.10.0
libtpu: 0.0.40
codegen_flags: <defaults>
</compile_context>

<pallas_src>
import functools
import math

import jax
import jax.numpy as jnp
from jax import lax
from jax.experimental import pallas as pl
from jax.experimental.pallas import tpu as pltpu

# ---------------- config (small stand-in for DistilBERT dims) ----------------
DIM = 64          # stands in for 768
N_HEADS = 4       # stands in for 12
HEAD_DIM = DIM // N_HEADS
FFN_DIM = 128     # stands in for 3072
N_LAYERS = 2      # stands in for 6
VOCAB = 100
MAX_POS = 16
OUT_DIM = 32      # stands in for 256 (the nn.Linear(768, 256))
LN_EPS = 1e-12
SEQ = 8
BATCH = 2

NEG_BIAS = -1e9   # additive key-padding mask bias (0 keep / -1e9 mask)
VMEM_LIMIT = 32 * 1024 * 1024   # explicit scoped-VMEM budget (safe on v5e/v6e/v7x)


# ----------------------------- in-kernel helpers ------------------------------
def _gelu(y):
    # TODO(synk): HF DistilBERT uses exact erf-GELU; tanh approximation kept here.
    c = math.sqrt(2.0 / math.pi)
    return 0.5 * y * (1.0 + jnp.tanh(c * (y + 0.044715 * y * y * y)))


def _layernorm(y, g, b, eps=LN_EPS):
    mu = jnp.mean(y, axis=-1, keepdims=True)
    yc = y - mu
    var = jnp.mean(yc * yc, axis=-1, keepdims=True)
    return yc * lax.rsqrt(var + eps) * g + b


# ---------------------------- fused per-layer kernel --------------------------
def _layer_kernel(x_ref, mbias_ref, in_g_ref, in_b_ref,
                  wqkv_ref, bqkv_ref, wo_ref, bo_ref, sa_g_ref, sa_b_ref,
                  w1_ref, b1_ref, w2_ref, b2_ref, out_g_ref, out_b_ref,
                  o_ref, *, n_heads, head_dim, scale, apply_input_ln):
    """One transformer layer for a single batch element (S, D) tile.

    Optionally applies the embedding LayerNorm as a prologue (layer 0 only).
    All matmuls use bf16 operands with f32 accumulation; softmax / LN / GELU f32.
    """
    x = x_ref[...]                                                    # (S, D) f32
    if apply_input_ln:                                                # static flag
        x = _layernorm(x, in_g_ref[...], in_b_ref[...])
    s_len, d = x.shape

    # ---- fused QKV projection: one (S,D)@(D,3D) bf16 matmul ----
    qkv = jnp.dot(x.astype(jnp.bfloat16), wqkv_ref[...],
                  preferred_element_type=jnp.float32) + bqkv_ref[...]  # (S, 3D) f32
    mbias = mbias_ref[...]                                             # (1, S) f32

    # ---- per-head attention; contexts written into one (S, D) ctx buffer ----
    ctx_parts = []
    for h in range(n_heads):                                           # static unroll
        lo = h * head_dim
        q = (qkv[:, lo:lo + head_dim] * scale).astype(jnp.bfloat16)    # (S, Dh)
        k = qkv[:, d + lo:d + lo + head_dim].astype(jnp.bfloat16)      # (S, Dh)
        v = qkv[:, 2 * d + lo:2 * d + lo + head_dim].astype(jnp.bfloat16)
        # contract last dims directly (no explicit K transpose); f32 scores
        s = lax.dot_general(q, k, (((1,), (1,)), ((), ())),
                            preferred_element_type=jnp.float32)        # (S, S)
        s = s + mbias                                                  # mask keys (f32)
        s = s - jnp.max(s, axis=-1, keepdims=True)
        p = jnp.exp(s)
        p = p * pl.reciprocal(jnp.sum(p, axis=-1, keepdims=True), approx=True)
        ctx_parts.append(jnp.dot(p.astype(jnp.bfloat16), v,
                                 preferred_element_type=jnp.float32))  # (S, Dh)
    ctx = jnp.concatenate(ctx_parts, axis=-1)                          # (S, D) f32

    # ---- single o-projection (K = D), residual, post-LN ----
    sa = jnp.dot(ctx.astype(jnp.bfloat16), wo_ref[...],
                 preferred_element_type=jnp.float32) + bo_ref[...]
    h1 = _layernorm(x + sa, sa_g_ref[...], sa_b_ref[...])              # (S, D) f32

    # ---- FFN: ff1 + GELU + ff2, residual, LN; intermediate never leaves VMEM ----
    ff = jnp.dot(h1.astype(jnp.bfloat16), w1_ref[...],
                 preferred_element_type=jnp.float32) + b1_ref[...]     # (S, F) f32
    ff = _gelu(ff)
    y = jnp.dot(ff.astype(jnp.bfloat16), w2_ref[...],
                preferred_element_type=jnp.float32) + b2_ref[...]      # (S, D) f32
    o_ref[...] = _layernorm(h1 + y, out_g_ref[...], out_b_ref[...])


def encoder_layer(x2, mask_bias, in_ln_g, in_ln_b, layer, *, batch, seq,
                  apply_input_ln):
    """x2: (B*S, D) f32 slab; mask_bias: (B, 1, S) additive; returns (B*S, D)."""
    M, D = x2.shape
    F = layer["ff1_w"].shape[1]
    scale = 1.0 / math.sqrt(HEAD_DIM)

    const = lambda b: (0, 0)
    # grid-invariant params: single-buffered (double-buffering buys nothing)
    wspec = lambda shp: pl.BlockSpec(shp, const, pipeline_mode=pl.Buffered(1))

    kernel = functools.partial(_layer_kernel, n_heads=N_HEADS, head_dim=HEAD_DIM,
                               scale=scale, apply_input_ln=apply_input_ln)
    return pl.pallas_call(
        kernel,
        out_shape=jax.ShapeDtypeStruct((M, D), jnp.float32),
        grid=(batch,),
        in_specs=[
            pl.BlockSpec((seq, D), lambda b: (b, 0)),             # rows of batch b
            pl.BlockSpec((None, 1, seq), lambda b: (b, 0, 0)),    # mask bias (1,S)
            wspec((1, D)),                                        # input-LN gamma
            wspec((1, D)),                                        # input-LN beta
            wspec((D, 3 * D)),                                    # fused QKV weight
            wspec((1, 3 * D)),                                    # fused QKV bias
            wspec((D, D)),                                        # o-proj weight
            wspec((1, D)),                                        # o-proj bias
            wspec((1, D)),                                        # sa-LN gamma
            wspec((1, D)),                                        # sa-LN beta
            wspec((D, F)),                                        # ff1 weight
            wspec((1, F)),                                        # ff1 bias
            wspec((F, D)),                                        # ff2 weight
            wspec((1, D)),                                        # ff2 bias
            wspec((1, D)),                                        # out-LN gamma
            wspec((1, D)),                                        # out-LN beta
        ],
        out_specs=pl.BlockSpec((seq, D), lambda b: (b, 0)),
        compiler_params=pltpu.CompilerParams(
            dimension_semantics=("parallel",),        # shards over 2 TCs on v7x
            vmem_limit_bytes=VMEM_LIMIT),
    )(x2, mask_bias,
      in_ln_g.reshape(1, D), in_ln_b.reshape(1, D),
      layer["qkv_w"], layer["qkv_b"].reshape(1, 3 * D),
      layer["o_w"], layer["o_b"].reshape(1, D),
      layer["sa_ln_g"].reshape(1, D), layer["sa_ln_b"].reshape(1, D),
      layer["ff1_w"], layer["ff1_b"].reshape(1, F),
      layer["ff2_w"], layer["ff2_b"].reshape(1, D),
      layer["out_ln_g"].reshape(1, D), layer["out_ln_b"].reshape(1, D))


# --------------------------- parameters (synthetic) ---------------------------
def init_params(key):
    def dense(k, fan_in, fan_out, wdtype=jnp.float32):
        kw, _ = jax.random.split(k)
        # weights stored as (in, out); equivalent to PyTorch Linear W.T
        w = (0.02 * jax.random.normal(kw, (fan_in, fan_out), jnp.float32)).astype(wdtype)
        b = jnp.zeros((fan_out,), jnp.float32)
        return w, b

    keys = jax.random.split(key, 4 + N_LAYERS)
    params = {
        "word_emb": 0.02 * jax.random.normal(keys[0], (VOCAB, DIM), jnp.float32),
        "pos_emb": 0.02 * jax.random.normal(keys[1], (MAX_POS, DIM), jnp.float32),
        "emb_ln_g": jnp.ones((DIM,), jnp.float32),
        "emb_ln_b": jnp.zeros((DIM,), jnp.float32),
        "layers": [],
    }
    for li in range(N_LAYERS):
        lk = jax.random.split(keys[2 + li], 6)
        # matmul weights stored bf16 (MXU operands); biases / LN params stay f32
        q_w, q_b = dense(lk[0], DIM, DIM, jnp.bfloat16)
        k_w, k_b = dense(lk[1], DIM, DIM, jnp.bfloat16)
        v_w, v_b = dense(lk[2], DIM, DIM, jnp.bfloat16)
        layer = {
            # fused QKV projection: one (D, 3D) matmul instead of three (D, D)
            "qkv_w": jnp.concatenate([q_w, k_w, v_w], axis=1),         # bf16
            "qkv_b": jnp.concatenate([q_b, k_b, v_b], axis=0),         # f32
        }
        layer["o_w"], layer["o_b"] = dense(lk[3], DIM, DIM, jnp.bfloat16)
        layer["sa_ln_g"] = jnp.ones((DIM,), jnp.float32)
        layer["sa_ln_b"] = jnp.zeros((DIM,), jnp.float32)
        layer["ff1_w"], layer["ff1_b"] = dense(lk[4], DIM, FFN_DIM, jnp.bfloat16)
        layer["ff2_w"], layer["ff2_b"] = dense(lk[5], FFN_DIM, DIM, jnp.bfloat16)
        layer["out_ln_g"] = jnp.ones((DIM,), jnp.float32)
        layer["out_ln_b"] = jnp.zeros((DIM,), jnp.float32)
        params["layers"].append(layer)
    params["fc_w"], params["fc_b"] = dense(keys[2 + N_LAYERS], DIM, OUT_DIM)
    return params


# ------------------------------- forward pass ---------------------------------
def text_encoder_forward(params, input_ids, attention_mask):
    B, S = input_ids.shape
    # embeddings: word + position (LayerNorm is fused into the layer-0 kernel;
    # dropout is identity in eval)
    we = jnp.take(params["word_emb"], input_ids, axis=0)            # (B, S, D)
    pe = params["pos_emb"][:S]                                      # (S, D)
    h2 = (we + pe[None]).reshape(B * S, DIM)

    # additive key-padding mask bias: 0 = keep, -1e9 = mask; shape (B, 1, S)
    mask_bias = ((1.0 - attention_mask.astype(jnp.float32)) * NEG_BIAS).reshape(B, 1, S)

    ident_g = jnp.ones((DIM,), jnp.float32)
    ident_b = jnp.zeros((DIM,), jnp.float32)
    for li, layer in enumerate(params["layers"]):
        if li == 0:
            in_g, in_b, apply_ln = params["emb_ln_g"], params["emb_ln_b"], True
        else:
            in_g, in_b, apply_ln = ident_g, ident_b, False          # unused refs
        h2 = encoder_layer(h2, mask_bias, in_g, in_b, layer,
                           batch=B, seq=S, apply_input_ln=apply_ln)

    last_hidden = h2.reshape(B, S, DIM)
    cls = last_hidden[:, 0, :]                                       # (B, D)
    # tiny classifier head: plain JAX (Pallas would be pure launch overhead)
    return cls @ params["fc_w"] + params["fc_b"]                     # (B, OUT_DIM)


# ------------------------------------ main -------------------------------------
if __name__ == "__main__":
    root = jax.random.PRNGKey(0)
    kp, kid = jax.random.split(root)
    params = init_params(kp)

    input_ids = jax.random.randint(kid, (BATCH, SEQ), 0, VOCAB, dtype=jnp.int32)
    lengths = jnp.array([SEQ, SEQ - 2], dtype=jnp.int32)
    attention_mask = (jnp.arange(SEQ)[None, :] < lengths[:, None]).astype(jnp.int32)

    fwd = jax.jit(text_encoder_forward)
    out = fwd(params, input_ids, attention_mask)
    out = jax.block_until_ready(out)
    assert out.shape == (BATCH, OUT_DIM) and out.dtype == jnp.float32
    assert bool(jnp.all(jnp.isfinite(out)))
    print("KERNEL_OK")
</pallas_src>

<mosaic_0001>
module attributes {stable_mosaic.version = 11 : i64} {
  func.func @_layer_kernel(%arg0: i32, %arg1: memref<8x64xf32, #tpu.memory_space<vmem>>, %arg2: memref<1x1x8xf32, #tpu.memory_space<vmem>>, %arg3: memref<1x64xf32, #tpu.memory_space<vmem>>, %arg4: memref<1x64xf32, #tpu.memory_space<vmem>>, %arg5: memref<64x192xbf16, #tpu.memory_space<vmem>>, %arg6: memref<1x192xf32, #tpu.memory_space<vmem>>, %arg7: memref<64x64xbf16, #tpu.memory_space<vmem>>, %arg8: memref<1x64xf32, #tpu.memory_space<vmem>>, %arg9: memref<1x64xf32, #tpu.memory_space<vmem>>, %arg10: memref<1x64xf32, #tpu.memory_space<vmem>>, %arg11: memref<64x128xbf16, #tpu.memory_space<vmem>>, %arg12: memref<1x128xf32, #tpu.memory_space<vmem>>, %arg13: memref<128x64xbf16, #tpu.memory_space<vmem>>, %arg14: memref<1x64xf32, #tpu.memory_space<vmem>>, %arg15: memref<1x64xf32, #tpu.memory_space<vmem>>, %arg16: memref<1x64xf32, #tpu.memory_space<vmem>>, %arg17: memref<8x64xf32, #tpu.memory_space<vmem>>) attributes {dimension_semantics = [#tpu.dimension_semantics<parallel>], iteration_bounds = array<i64: 2>, scalar_prefetch = 0 : i64, scratch_operands = 0 : i64, tpu.core_type = #tpu.core_type<tc>, window_params = [{transform_indices = @transform_0, window_bounds = array<i64: 8, 64>}, {transform_indices = @transform_1, window_bounds = array<i64: 1, 1, 8>}, {pipeline_mode = #tpu.pipeline_mode<synchronous>, transform_indices = @transform_2, window_bounds = array<i64: 1, 64>}, {pipeline_mode = #tpu.pipeline_mode<synchronous>, transform_indices = @transform_3, window_bounds = array<i64: 1, 64>}, {pipeline_mode = #tpu.pipeline_mode<synchronous>, transform_indices = @transform_4, window_bounds = array<i64: 64, 192>}, {pipeline_mode = #tpu.pipeline_mode<synchronous>, transform_indices = @transform_5, window_bounds = array<i64: 1, 192>}, {pipeline_mode = #tpu.pipeline_mode<synchronous>, transform_indices = @transform_6, window_bounds = array<i64: 64, 64>}, {pipeline_mode = #tpu.pipeline_mode<synchronous>, transform_indices = @transform_7, window_bounds = array<i64: 1, 64>}, {pipeline_mode = #tpu.pipeline_mode<synchronous>, transform_indices = @transform_8, window_bounds = array<i64: 1, 64>}, {pipeline_mode = #tpu.pipeline_mode<synchronous>, transform_indices = @transform_9, window_bounds = array<i64: 1, 64>}, {pipeline_mode = #tpu.pipeline_mode<synchronous>, transform_indices = @transform_10, window_bounds = array<i64: 64, 128>}, {pipeline_mode = #tpu.pipeline_mode<synchronous>, transform_indices = @transform_11, window_bounds = array<i64: 1, 128>}, {pipeline_mode = #tpu.pipeline_mode<synchronous>, transform_indices = @transform_12, window_bounds = array<i64: 128, 64>}, {pipeline_mode = #tpu.pipeline_mode<synchronous>, transform_indices = @transform_13, window_bounds = array<i64: 1, 64>}, {pipeline_mode = #tpu.pipeline_mode<synchronous>, transform_indices = @transform_14, window_bounds = array<i64: 1, 64>}, {pipeline_mode = #tpu.pipeline_mode<synchronous>, transform_indices = @transform_15, window_bounds = array<i64: 1, 64>}, {transform_indices = @transform_16, window_bounds = array<i64: 8, 64>}]} {
    %c0 = arith.constant 0 : index
    %c0_0 = arith.constant 0 : index
    %0 = vector.load %arg1[%c0, %c0_0] : memref<8x64xf32, #tpu.memory_space<vmem>>, vector<8x64xf32>
    %c0_1 = arith.constant 0 : index
    %c0_2 = arith.constant 0 : index
    %1 = vector.load %arg3[%c0_1, %c0_2] : memref<1x64xf32, #tpu.memory_space<vmem>>, vector<1x64xf32>
    %c0_3 = arith.constant 0 : index
    %c0_4 = arith.constant 0 : index
    %2 = vector.load %arg4[%c0_3, %c0_4] : memref<1x64xf32, #tpu.memory_space<vmem>>, vector<1x64xf32>
    %cst = arith.constant dense<0.000000e+00> : vector<8xf32>
    %3 = vector.multi_reduction <add>, %0, %cst [1] : vector<8x64xf32> to vector<8xf32>
    %4 = vector.shape_cast %3 : vector<8xf32> to vector<8x1xf32>
    %cst_5 = arith.constant 6.400000e+01 : f32
    %5 = vector.broadcast %cst_5 : f32 to vector<8x1xf32>
    %6 = arith.divf %4, %5 : vector<8x1xf32>
    %7 = vector.broadcast %6 : vector<8x1xf32> to vector<8x64xf32>
    %8 = arith.subf %0, %7 : vector<8x64xf32>
    %9 = arith.mulf %8, %8 : vector<8x64xf32>
    %cst_6 = arith.constant dense<0.000000e+00> : vector<8xf32>
    %10 = vector.multi_reduction <add>, %9, %cst_6 [1] : vector<8x64xf32> to vector<8xf32>
    %11 = vector.shape_cast %10 : vector<8xf32> to vector<8x1xf32>
    %cst_7 = arith.constant 6.400000e+01 : f32
    %12 = vector.broadcast %cst_7 : f32 to vector<8x1xf32>
    %13 = arith.divf %11, %12 : vector<8x1xf32>
    %cst_8 = arith.constant 9.99999996E-13 : f32
    %14 = vector.broadcast %cst_8 : f32 to vector<8x1xf32>
    %15 = arith.addf %13, %14 : vector<8x1xf32>
    %16 = math.rsqrt %15 : vector<8x1xf32>
    %17 = vector.broadcast %16 : vector<8x1xf32> to vector<8x64xf32>
    %18 = arith.mulf %8, %17 : vector<8x64xf32>
    %19 = vector.broadcast %1 : vector<1x64xf32> to vector<8x64xf32>
    %20 = arith.mulf %18, %19 : vector<8x64xf32>
    %21 = vector.broadcast %2 : vector<1x64xf32> to vector<8x64xf32>
    %22 = arith.addf %20, %21 : vector<8x64xf32>
    %23 = arith.truncf %22 : vector<8x64xf32> to vector<8x64xbf16>
    %c0_9 = arith.constant 0 : index
    %c0_10 = arith.constant 0 : index
    %24 = vector.load %arg5[%c0_9, %c0_10] : memref<64x192xbf16, #tpu.memory_space<vmem>>, vector<64x192xbf16>
    %cst_11 = arith.constant dense<0.000000e+00> : vector<8x192xf32>
    %25 = tpu.matmul %23, %24, %cst_11 {dimension_numbers = #tpu.dot_dimension_numbers<[1], [0], [0], [1], [0, 0, 1, 1], [], []>} : vector<8x64xbf16>, vector<64x192xbf16>, vector<8x192xf32> -> vector<8x192xf32>
    %c0_12 = arith.constant 0 : index
    %c0_13 = arith.constant 0 : index
    %26 = vector.load %arg6[%c0_12, %c0_13] : memref<1x192xf32, #tpu.memory_space<vmem>>, vector<1x192xf32>
    %27 = vector.broadcast %26 : vector<1x192xf32> to vector<8x192xf32>
    %28 = arith.addf %25, %27 : vector<8x192xf32>
    %c0_14 = arith.constant 0 : index
    %c0_15 = arith.constant 0 : index
    %c0_16 = arith.constant 0 : index
    %29 = vector.load %arg2[%c0_14, %c0_15, %c0_16] : memref<1x1x8xf32, #tpu.memory_space<vmem>>, vector<1x1x8xf32>
    %30 = vector.shape_cast %29 : vector<1x1x8xf32> to vector<1x8xf32>
    %31 = vector.extract_strided_slice %28 {offsets = [0, 0], sizes = [8, 16], strides = [1, 1]} : vector<8x192xf32> to vector<8x16xf32>
    %cst_17 = arith.constant 2.500000e-01 : f32
    %32 = vector.broadcast %cst_17 : f32 to vector<8x16xf32>
    %33 = arith.mulf %31, %32 : vector<8x16xf32>
    %34 = arith.truncf %33 : vector<8x16xf32> to vector<8x16xbf16>
    %35 = vector.extract_strided_slice %28 {offsets = [0, 64], sizes = [8, 16], strides = [1, 1]} : vector<8x192xf32> to vector<8x16xf32>
    %36 = arith.truncf %35 : vector<8x16xf32> to vector<8x16xbf16>
    %37 = vector.extract_strided_slice %28 {offsets = [0, 128], sizes = [8, 16], strides = [1, 1]} : vector<8x192xf32> to vector<8x16xf32>
    %38 = arith.truncf %37 : vector<8x16xf32> to vector<8x16xbf16>
    %cst_18 = arith.constant dense<0.000000e+00> : vector<8x8xf32>
    %39 = tpu.matmul %34, %36, %cst_18 {dimension_numbers = #tpu.dot_dimension_numbers<[1], [1], [0], [0], [0, 0, 1, 0], [], []>} : vector<8x16xbf16>, vector<8x16xbf16>, vector<8x8xf32> -> vector<8x8xf32>
    %40 = vector.broadcast %30 : vector<1x8xf32> to vector<8x8xf32>
    %41 = arith.addf %39, %40 : vector<8x8xf32>
    %cst_19 = arith.constant dense<0xFF800000> : vector<8xf32>
    %42 = vector.multi_reduction <maximumf>, %41, %cst_19 [1] : vector<8x8xf32> to vector<8xf32>
    %43 = vector.shape_cast %42 : vector<8xf32> to vector<8x1xf32>
    %44 = vector.broadcast %43 : vector<8x1xf32> to vector<8x8xf32>
    %45 = arith.subf %41, %44 : vector<8x8xf32>
    %46 = math.exp %45 : vector<8x8xf32>
    %cst_20 = arith.constant dense<0.000000e+00> : vector<8xf32>
    %47 = vector.multi_reduction <add>, %46, %cst_20 [1] : vector<8x8xf32> to vector<8xf32>
    %48 = vector.shape_cast %47 : vector<8xf32> to vector<8x1xf32>
    %49 = tpu.reciprocal %48 {approx = true} : vector<8x1xf32> -> vector<8x1xf32>
    %50 = vector.broadcast %49 : vector<8x1xf32> to vector<8x8xf32>
    %51 = arith.mulf %46, %50 : vector<8x8xf32>
    %52 = arith.truncf %51 : vector<8x8xf32> to vector<8x8xbf16>
    %cst_21 = arith.constant dense<0.000000e+00> : vector<8x16xf32>
    %53 = tpu.matmul %52, %38, %cst_21 {dimension_numbers = #tpu.dot_dimension_numbers<[1], [0], [0], [1], [0, 0, 1, 1], [], []>} : vector<8x8xbf16>, vector<8x16xbf16>, vector<8x16xf32> -> vector<8x16xf32>
    %54 = vector.extract_strided_slice %28 {offsets = [0, 16], sizes = [8, 16], strides = [1, 1]} : vector<8x192xf32> to vector<8x16xf32>
    %cst_22 = arith.constant 2.500000e-01 : f32
    %55 = vector.broadcast %cst_22 : f32 to vector<8x16xf32>
    %56 = arith.mulf %54, %55 : vector<8x16xf32>
    %57 = arith.truncf %56 : vector<8x16xf32> to vector<8x16xbf16>
    %58 = vector.extract_strided_slice %28 {offsets = [0, 80], sizes = [8, 16], strides = [1, 1]} : vector<8x192xf32> to vector<8x16xf32>
    %59 = arith.truncf %58 : vector<8x16xf32> to vector<8x16xbf16>
    %60 = vector.extract_strided_slice %28 {offsets = [0, 144], sizes = [8, 16], strides = [1, 1]} : vector<8x192xf32> to vector<8x16xf32>
    %61 = arith.truncf %60 : vector<8x16xf32> to vector<8x16xbf16>
    %cst_23 = arith.constant dense<0.000000e+00> : vector<8x8xf32>
    %62 = tpu.matmul %57, %59, %cst_23 {dimension_numbers = #tpu.dot_dimension_numbers<[1], [1], [0], [0], [0, 0, 1, 0], [], []>} : vector<8x16xbf16>, vector<8x16xbf16>, vector<8x8xf32> -> vector<8x8xf32>
    %63 = vector.broadcast %30 : vector<1x8xf32> to vector<8x8xf32>
    %64 = arith.addf %62, %63 : vector<8x8xf32>
    %cst_24 = arith.constant dense<0xFF800000> : vector<8xf32>
    %65 = vector.multi_reduction <maximumf>, %64, %cst_24 [1] : vector<8x8xf32> to vector<8xf32>
    %66 = vector.shape_cast %65 : vector<8xf32> to vector<8x1xf32>
    %67 = vector.broadcast %66 : vector<8x1xf32> to vector<8x8xf32>
    %68 = arith.subf %64, %67 : vector<8x8xf32>
    %69 = math.exp %68 : vector<8x8xf32>
    %cst_25 = arith.constant dense<0.000000e+00> : vector<8xf32>
    %70 = vector.multi_reduction <add>, %69, %cst_25 [1] : vector<8x8xf32> to vector<8xf32>
    %71 = vector.shape_cast %70 : vector<8xf32> to vector<8x1xf32>
    %72 = tpu.reciprocal %71 {approx = true} : vector<8x1xf32> -> vector<8x1xf32>
    %73 = vector.broadcast %72 : vector<8x1xf32> to vector<8x8xf32>
    %74 = arith.mulf %69, %73 : vector<8x8xf32>
    %75 = arith.truncf %74 : vector<8x8xf32> to vector<8x8xbf16>
    %cst_26 = arith.constant dense<0.000000e+00> : vector<8x16xf32>
    %76 = tpu.matmul %75, %61, %cst_26 {dimension_numbers = #tpu.dot_dimension_numbers<[1], [0], [0], [1], [0, 0, 1, 1], [], []>} : vector<8x8xbf16>, vector<8x16xbf16>, vector<8x16xf32> -> vector<8x16xf32>
    %77 = vector.extract_strided_slice %28 {offsets = [0, 32], sizes = [8, 16], strides = [1, 1]} : vector<8x192xf32> to vector<8x16xf32>
    %cst_27 = arith.constant 2.500000e-01 : f32
    %78 = vector.broadcast %cst_27 : f32 to vector<8x16xf32>
    %79 = arith.mulf %77, %78 : vector<8x16xf32>
    %80 = arith.truncf %79 : vector<8x16xf32> to vector<8x16xbf16>
    %81 = vector.extract_strided_slice %28 {offsets = [0, 96], sizes = [8, 16], strides = [1, 1]} : vector<8x192xf32> to vector<8x16xf32>
    %82 = arith.truncf %81 : vector<8x16xf32> to vector<8x16xbf16>
    %83 = vector.extract_strided_slice %28 {offsets = [0, 160], sizes = [8, 16], strides = [1, 1]} : vector<8x192xf32> to vector<8x16xf32>
    %84 = arith.truncf %83 : vector<8x16xf32> to vector<8x16xbf16>
    %cst_28 = arith.constant dense<0.000000e+00> : vector<8x8xf32>
    %85 = tpu.matmul %80, %82, %cst_28 {dimension_numbers = #tpu.dot_dimension_numbers<[1], [1], [0], [0], [0, 0, 1, 0], [], []>} : vector<8x16xbf16>, vector<8x16xbf16>, vector<8x8xf32> -> vector<8x8xf32>
    %86 = vector.broadcast %30 : vector<1x8xf32> to vector<8x8xf32>
    %87 = arith.addf %85, %86 : vector<8x8xf32>
    %cst_29 = arith.constant dense<0xFF800000> : vector<8xf32>
    %88 = vector.multi_reduction <maximumf>, %87, %cst_29 [1] : vector<8x8xf32> to vector<8xf32>
    %89 = vector.shape_cast %88 : vector<8xf32> to vector<8x1xf32>
    %90 = vector.broadcast %89 : vector<8x1xf32> to vector<8x8xf32>
    %91 = arith.subf %87, %90 : vector<8x8xf32>
    %92 = math.exp %91 : vector<8x8xf32>
    %cst_30 = arith.constant dense<0.000000e+00> : vector<8xf32>
    %93 = vector.multi_reduction <add>, %92, %cst_30 [1] : vector<8x8xf32> to vector<8xf32>
    %94 = vector.shape_cast %93 : vector<8xf32> to vector<8x1xf32>
    %95 = tpu.reciprocal %94 {approx = true} : vector<8x1xf32> -> vector<8x1xf32>
    %96 = vector.broadcast %95 : vector<8x1xf32> to vector<8x8xf32>
    %97 = arith.mulf %92, %96 : vector<8x8xf32>
    %98 = arith.truncf %97 : vector<8x8xf32> to vector<8x8xbf16>
    %cst_31 = arith.constant dense<0.000000e+00> : vector<8x16xf32>
    %99 = tpu.matmul %98, %84, %cst_31 {dimension_numbers = #tpu.dot_dimension_numbers<[1], [0], [0], [1], [0, 0, 1, 1], [], []>} : vector<8x8xbf16>, vector<8x16xbf16>, vector<8x16xf32> -> vector<8x16xf32>
    %100 = vector.extract_strided_slice %28 {offsets = [0, 48], sizes = [8, 16], strides = [1, 1]} : vector<8x192xf32> to vector<8x16xf32>
    %cst_32 = arith.constant 2.500000e-01 : f32
    %101 = vector.broadcast %cst_32 : f32 to vector<8x16xf32>
    %102 = arith.mulf %100, %101 : vector<8x16xf32>
    %103 = arith.truncf %102 : vector<8x16xf32> to vector<8x16xbf16>
    %104 = vector.extract_strided_slice %28 {offsets = [0, 112], sizes = [8, 16], strides = [1, 1]} : vector<8x192xf32> to vector<8x16xf32>
    %105 = arith.truncf %104 : vector<8x16xf32> to vector<8x16xbf16>
    %106 = vector.extract_strided_slice %28 {offsets = [0, 176], sizes = [8, 16], strides = [1, 1]} : vector<8x192xf32> to vector<8x16xf32>
    %107 = arith.truncf %106 : vector<8x16xf32> to vector<8x16xbf16>
    %cst_33 = arith.constant dense<0.000000e+00> : vector<8x8xf32>
    %108 = tpu.matmul %103, %105, %cst_33 {dimension_numbers = #tpu.dot_dimension_numbers<[1], [1], [0], [0], [0, 0, 1, 0], [], []>} : vector<8x16xbf16>, vector<8x16xbf16>, vector<8x8xf32> -> vector<8x8xf32>
    %109 = vector.broadcast %30 : vector<1x8xf32> to vector<8x8xf32>
    %110 = arith.addf %108, %109 : vector<8x8xf32>
    %cst_34 = arith.constant dense<0xFF800000> : vector<8xf32>
    %111 = vector.multi_reduction <maximumf>, %110, %cst_34 [1] : vector<8x8xf32> to vector<8xf32>
    %112 = vector.shape_cast %111 : vector<8xf32> to vector<8x1xf32>
    %113 = vector.broadcast %112 : vector<8x1xf32> to vector<8x8xf32>
    %114 = arith.subf %110, %113 : vector<8x8xf32>
    %115 = math.exp %114 : vector<8x8xf32>
    %cst_35 = arith.constant dense<0.000000e+00> : vector<8xf32>
    %116 = vector.multi_reduction <add>, %115, %cst_35 [1] : vector<8x8xf32> to vector<8xf32>
    %117 = vector.shape_cast %116 : vector<8xf32> to vector<8x1xf32>
    %118 = tpu.reciprocal %117 {approx = true} : vector<8x1xf32> -> vector<8x1xf32>
    %119 = vector.broadcast %118 : vector<8x1xf32> to vector<8x8xf32>
    %120 = arith.mulf %115, %119 : vector<8x8xf32>
    %121 = arith.truncf %120 : vector<8x8xf32> to vector<8x8xbf16>
    %cst_36 = arith.constant dense<0.000000e+00> : vector<8x16xf32>
    %122 = tpu.matmul %121, %107, %cst_36 {dimension_numbers = #tpu.dot_dimension_numbers<[1], [0], [0], [1], [0, 0, 1, 1], [], []>} : vector<8x8xbf16>, vector<8x16xbf16>, vector<8x16xf32> -> vector<8x16xf32>
    %123 = tpu.concatenate %53, %76, %99, %122 in 1 : vector<8x16xf32>, vector<8x16xf32>, vector<8x16xf32>, vector<8x16xf32> -> vector<8x64xf32>
    %124 = arith.truncf %123 : vector<8x64xf32> to vector<8x64xbf16>
    %c0_37 = arith.constant 0 : index
    %c0_38 = arith.constant 0 : index
    %125 = vector.load %arg7[%c0_37, %c0_38] : memref<64x64xbf16, #tpu.memory_space<vmem>>, vector<64x64xbf16>
    %cst_39 = arith.constant dense<0.000000e+00> : vector<8x64xf32>
    %126 = tpu.matmul %124, %125, %cst_39 {dimension_numbers = #tpu.dot_dimension_numbers<[1], [0], [0], [1], [0, 0, 1, 1], [], []>} : vector<8x64xbf16>, vector<64x64xbf16>, vector<8x64xf32> -> vector<8x64xf32>
    %c0_40 = arith.constant 0 : index
    %c0_41 = arith.constant 0 : index
    %127 = vector.load %arg8[%c0_40, %c0_41] : memref<1x64xf32, #tpu.memory_space<vmem>>, vector<1x64xf32>
    %128 = vector.broadcast %127 : vector<1x64xf32> to vector<8x64xf32>
    %129 = arith.addf %126, %128 : vector<8x64xf32>
    %130 = arith.addf %22, %129 : vector<8x64xf32>
    %c0_42 = arith.constant 0 : index
    %c0_43 = arith.constant 0 : index
    %131 = vector.load %arg9[%c0_42, %c0_43] : memref<1x64xf32, #tpu.memory_space<vmem>>, vector<1x64xf32>
    %c0_44 = arith.constant 0 : index
    %c0_45 = arith.constant 0 : index
    %132 = vector.load %arg10[%c0_44, %c0_45] : memref<1x64xf32, #tpu.memory_space<vmem>>, vector<1x64xf32>
    %cst_46 = arith.constant dense<0.000000e+00> : vector<8xf32>
    %133 = vector.multi_reduction <add>, %130, %cst_46 [1] : vector<8x64xf32> to vector<8xf32>
    %134 = vector.shape_cast %133 : vector<8xf32> to vector<8x1xf32>
    %cst_47 = arith.constant 6.400000e+01 : f32
    %135 = vector.broadcast %cst_47 : f32 to vector<8x1xf32>
    %136 = arith.divf %134, %135 : vector<8x1xf32>
    %137 = vector.broadcast %136 : vector<8x1xf32> to vector<8x64xf32>
    %138 = arith.subf %130, %137 : vector<8x64xf32>
    %139 = arith.mulf %138, %138 : vector<8x64xf32>
    %cst_48 = arith.constant dense<0.000000e+00> : vector<8xf32>
    %140 = vector.multi_reduction <add>, %139, %cst_48 [1] : vector<8x64xf32> to vector<8xf32>
    %141 = vector.shape_cast %140 : vector<8xf32> to vector<8x1xf32>
    %cst_49 = arith.constant 6.400000e+01 : f32
    %142 = vector.broadcast %cst_49 : f32 to vector<8x1xf32>
    %143 = arith.divf %141, %142 : vector<8x1xf32>
    %cst_50 = arith.constant 9.99999996E-13 : f32
    %144 = vector.broadcast %cst_50 : f32 to vector<8x1xf32>
    %145 = arith.addf %143, %144 : vector<8x1xf32>
    %146 = math.rsqrt %145 : vector<8x1xf32>
    %147 = vector.broadcast %146 : vector<8x1xf32> to vector<8x64xf32>
    %148 = arith.mulf %138, %147 : vector<8x64xf32>
    %149 = vector.broadcast %131 : vector<1x64xf32> to vector<8x64xf32>
    %150 = arith.mulf %148, %149 : vector<8x64xf32>
    %151 = vector.broadcast %132 : vector<1x64xf32> to vector<8x64xf32>
    %152 = arith.addf %150, %151 : vector<8x64xf32>
    %153 = arith.truncf %152 : vector<8x64xf32> to vector<8x64xbf16>
    %c0_51 = arith.constant 0 : index
    %c0_52 = arith.constant 0 : index
    %154 = vector.load %arg11[%c0_51, %c0_52] : memref<64x128xbf16, #tpu.memory_space<vmem>>, vector<64x128xbf16>
    %cst_53 = arith.constant dense<0.000000e+00> : vector<8x128xf32>
    %155 = tpu.matmul %153, %154, %cst_53 {dimension_numbers = #tpu.dot_dimension_numbers<[1], [0], [0], [1], [0, 0, 1, 1], [], []>} : vector<8x64xbf16>, vector<64x128xbf16>, vector<8x128xf32> -> vector<8x128xf32>
    %c0_54 = arith.constant 0 : index
    %c0_55 = arith.constant 0 : index
    %156 = vector.load %arg12[%c0_54, %c0_55] : memref<1x128xf32, #tpu.memory_space<vmem>>, vector<1x128xf32>
    %157 = vector.broadcast %156 : vector<1x128xf32> to vector<8x128xf32>
    %158 = arith.addf %155, %157 : vector<8x128xf32>
    %cst_56 = arith.constant 5.000000e-01 : f32
    %159 = vector.broadcast %cst_56 : f32 to vector<8x128xf32>
    %160 = arith.mulf %159, %158 : vector<8x128xf32>
    %cst_57 = arith.constant 4.471500e-02 : f32
    %161 = vector.broadcast %cst_57 : f32 to vector<8x128xf32>
    %162 = arith.mulf %161, %158 : vector<8x128xf32>
    %163 = arith.mulf %162, %158 : vector<8x128xf32>
    %164 = arith.mulf %163, %158 : vector<8x128xf32>
    %165 = arith.addf %158, %164 : vector<8x128xf32>
    %cst_58 = arith.constant 0.797884583 : f32
    %166 = vector.broadcast %cst_58 : f32 to vector<8x128xf32>
    %167 = arith.mulf %166, %165 : vector<8x128xf32>
    %168 = math.tanh %167 : vector<8x128xf32>
    %cst_59 = arith.constant 1.000000e+00 : f32
    %169 = vector.broadcast %cst_59 : f32 to vector<8x128xf32>
    %170 = arith.addf %169, %168 : vector<8x128xf32>
    %171 = arith.mulf %160, %170 : vector<8x128xf32>
    %172 = arith.truncf %171 : vector<8x128xf32> to vector<8x128xbf16>
    %c0_60 = arith.constant 0 : index
    %c0_61 = arith.constant 0 : index
    %173 = vector.load %arg13[%c0_60, %c0_61] : memref<128x64xbf16, #tpu.memory_space<vmem>>, vector<128x64xbf16>
    %cst_62 = arith.constant dense<0.000000e+00> : vector<8x64xf32>
    %174 = tpu.matmul %172, %173, %cst_62 {dimension_numbers = #tpu.dot_dimension_numbers<[1], [0], [0], [1], [0, 0, 1, 1], [], []>} : vector<8x128xbf16>, vector<128x64xbf16>, vector<8x64xf32> -> vector<8x64xf32>
    %c0_63 = arith.constant 0 : index
    %c0_64 = arith.constant 0 : index
    %175 = vector.load %arg14[%c0_63, %c0_64] : memref<1x64xf32, #tpu.memory_space<vmem>>, vector<1x64xf32>
    %176 = vector.broadcast %175 : vector<1x64xf32> to vector<8x64xf32>
    %177 = arith.addf %174, %176 : vector<8x64xf32>
    %178 = arith.addf %152, %177 : vector<8x64xf32>
    %c0_65 = arith.constant 0 : index
    %c0_66 = arith.constant 0 : index
    %179 = vector.load %arg15[%c0_65, %c0_66] : memref<1x64xf32, #tpu.memory_space<vmem>>, vector<1x64xf32>
    %c0_67 = arith.constant 0 : index
    %c0_68 = arith.constant 0 : index
    %180 = vector.load %arg16[%c0_67, %c0_68] : memref<1x64xf32, #tpu.memory_space<vmem>>, vector<1x64xf32>
    %cst_69 = arith.constant dense<0.000000e+00> : vector<8xf32>
    %181 = vector.multi_reduction <add>, %178, %cst_69 [1] : vector<8x64xf32> to vector<8xf32>
    %182 = vector.shape_cast %181 : vector<8xf32> to vector<8x1xf32>
    %cst_70 = arith.constant 6.400000e+01 : f32
    %183 = vector.broadcast %cst_70 : f32 to vector<8x1xf32>
    %184 = arith.divf %182, %183 : vector<8x1xf32>
    %185 = vector.broadcast %184 : vector<8x1xf32> to vector<8x64xf32>
    %186 = arith.subf %178, %185 : vector<8x64xf32>
    %187 = arith.mulf %186, %186 : vector<8x64xf32>
    %cst_71 = arith.constant dense<0.000000e+00> : vector<8xf32>
    %188 = vector.multi_reduction <add>, %187, %cst_71 [1] : vector<8x64xf32> to vector<8xf32>
    %189 = vector.shape_cast %188 : vector<8xf32> to vector<8x1xf32>
    %cst_72 = arith.constant 6.400000e+01 : f32
    %190 = vector.broadcast %cst_72 : f32 to vector<8x1xf32>
    %191 = arith.divf %189, %190 : vector<8x1xf32>
    %cst_73 = arith.constant 9.99999996E-13 : f32
    %192 = vector.broadcast %cst_73 : f32 to vector<8x1xf32>
    %193 = arith.addf %191, %192 : vector<8x1xf32>
    %194 = math.rsqrt %193 : vector<8x1xf32>
    %195 = vector.broadcast %194 : vector<8x1xf32> to vector<8x64xf32>
    %196 = arith.mulf %186, %195 : vector<8x64xf32>
    %197 = vector.broadcast %179 : vector<1x64xf32> to vector<8x64xf32>
    %198 = arith.mulf %196, %197 : vector<8x64xf32>
    %199 = vector.broadcast %180 : vector<1x64xf32> to vector<8x64xf32>
    %200 = arith.addf %198, %199 : vector<8x64xf32>
    %c0_74 = arith.constant 0 : index
    %c0_75 = arith.constant 0 : index
    %201 = vector.load %arg17[%c0_74, %c0_75] : memref<8x64xf32, #tpu.memory_space<vmem>>, vector<8x64xf32>
    tpu.vector_store %arg17[%c0_74, %c0_75], %200 {strides = array<i32>} : memref<8x64xf32, #tpu.memory_space<vmem>>, vector<8x64xf32>,
    return
  }
  func.func @transform_0(%arg0: i32) -> (i32, i32) {
    %c0_i32 = arith.constant 0 : i32
    %c0_i32_0 = arith.constant 0 : i32
    return %arg0, %c0_i32 : i32, i32
  }
  func.func @transform_1(%arg0: i32) -> (i32, i32, i32) {
    %c0_i32 = arith.constant 0 : i32
    %c0_i32_0 = arith.constant 0 : i32
    %c0_i32_1 = arith.constant 0 : i32
    return %arg0, %c0_i32, %c0_i32_0 : i32, i32, i32
  }
  func.func @transform_2(%arg0: i32) -> (i32, i32) {
    %c0_i32 = arith.constant 0 : i32
    %c0_i32_0 = arith.constant 0 : i32
    %c0_i32_1 = arith.constant 0 : i32
    return %c0_i32, %c0_i32_0 : i32, i32
  }
  func.func @transform_3(%arg0: i32) -> (i32, i32) {
    %c0_i32 = arith.constant 0 : i32
    %c0_i32_0 = arith.constant 0 : i32
    %c0_i32_1 = arith.constant 0 : i32
    return %c0_i32, %c0_i32_0 : i32, i32
  }
  func.func @transform_4(%arg0: i32) -> (i32, i32) {
    %c0_i32 = arith.constant 0 : i32
    %c0_i32_0 = arith.constant 0 : i32
    %c0_i32_1 = arith.constant 0 : i32
    return %c0_i32, %c0_i32_0 : i32, i32
  }
  func.func @transform_5(%arg0: i32) -> (i32, i32) {
    %c0_i32 = arith.constant 0 : i32
    %c0_i32_0 = arith.constant 0 : i32
    %c0_i32_1 = arith.constant 0 : i32
    return %c0_i32, %c0_i32_0 : i32, i32
  }
  func.func @transform_6(%arg0: i32) -> (i32, i32) {
    %c0_i32 = arith.constant 0 : i32
    %c0_i32_0 = arith.constant 0 : i32
    %c0_i32_1 = arith.constant 0 : i32
    return %c0_i32, %c0_i32_0 : i32, i32
  }
  func.func @transform_7(%arg0: i32) -> (i32, i32) {
    %c0_i32 = arith.constant 0 : i32
    %c0_i32_0 = arith.constant 0 : i32
    %c0_i32_1 = arith.constant 0 : i32
    return %c0_i32, %c0_i32_0 : i32, i32
  }
  func.func @transform_8(%arg0: i32) -> (i32, i32) {
    %c0_i32 = arith.constant 0 : i32
    %c0_i32_0 = arith.constant 0 : i32
    %c0_i32_1 = arith.constant 0 : i32
    return %c0_i32, %c0_i32_0 : i32, i32
  }
  func.func @transform_9(%arg0: i32) -> (i32, i32) {
    %c0_i32 = arith.constant 0 : i32
    %c0_i32_0 = arith.constant 0 : i32
    %c0_i32_1 = arith.constant 0 : i32
    return %c0_i32, %c0_i32_0 : i32, i32
  }
  func.func @transform_10(%arg0: i32) -> (i32, i32) {
    %c0_i32 = arith.constant 0 : i32
    %c0_i32_0 = arith.constant 0 : i32
    %c0_i32_1 = arith.constant 0 : i32
    return %c0_i32, %c0_i32_0 : i32, i32
  }
  func.func @transform_11(%arg0: i32) -> (i32, i32) {
    %c0_i32 = arith.constant 0 : i32
    %c0_i32_0 = arith.constant 0 : i32
    %c0_i32_1 = arith.constant 0 : i32
    return %c0_i32, %c0_i32_0 : i32, i32
  }
  func.func @transform_12(%arg0: i32) -> (i32, i32) {
    %c0_i32 = arith.constant 0 : i32
    %c0_i32_0 = arith.constant 0 : i32
    %c0_i32_1 = arith.constant 0 : i32
    return %c0_i32, %c0_i32_0 : i32, i32
  }
  func.func @transform_13(%arg0: i32) -> (i32, i32) {
    %c0_i32 = arith.constant 0 : i32
    %c0_i32_0 = arith.constant 0 : i32
    %c0_i32_1 = arith.constant 0 : i32
    return %c0_i32, %c0_i32_0 : i32, i32
  }
  func.func @transform_14(%arg0: i32) -> (i32, i32) {
    %c0_i32 = arith.constant 0 : i32
    %c0_i32_0 = arith.constant 0 : i32
    %c0_i32_1 = arith.constant 0 : i32
    return %c0_i32, %c0_i32_0 : i32, i32
  }
  func.func @transform_15(%arg0: i32) -> (i32, i32) {
    %c0_i32 = arith.constant 0 : i32
    %c0_i32_0 = arith.constant 0 : i32
    %c0_i32_1 = arith.constant 0 : i32
    return %c0_i32, %c0_i32_0 : i32, i32
  }
  func.func @transform_16(%arg0: i32) -> (i32, i32) {
    %c0_i32 = arith.constant 0 : i32
    %c0_i32_0 = arith.constant 0 : i32
    return %arg0, %c0_i32 : i32, i32
  }
}

module attributes {stable_mosaic.version = 11 : i64} {
  func.func @_layer_kernel(%arg0: i32, %arg1: memref<8x64xf32, #tpu.memory_space<vmem>>, %arg2: memref<1x1x8xf32, #tpu.memory_space<vmem>>, %arg3: memref<1x64xf32, #tpu.memory_space<vmem>>, %arg4: memref<1x64xf32, #tpu.memory_space<vmem>>, %arg5: memref<64x192xbf16, #tpu.memory_space<vmem>>, %arg6: memref<1x192xf32, #tpu.memory_space<vmem>>, %arg7: memref<64x64xbf16, #tpu.memory_space<vmem>>, %arg8: memref<1x64xf32, #tpu.memory_space<vmem>>, %arg9: memref<1x64xf32, #tpu.memory_space<vmem>>, %arg10: memref<1x64xf32, #tpu.memory_space<vmem>>, %arg11: memref<64x128xbf16, #tpu.memory_space<vmem>>, %arg12: memref<1x128xf32, #tpu.memory_space<vmem>>, %arg13: memref<128x64xbf16, #tpu.memory_space<vmem>>, %arg14: memref<1x64xf32, #tpu.memory_space<vmem>>, %arg15: memref<1x64xf32, #tpu.memory_space<vmem>>, %arg16: memref<1x64xf32, #tpu.memory_space<vmem>>, %arg17: memref<8x64xf32, #tpu.memory_space<vmem>>) attributes {dimension_semantics = [#tpu.dimension_semantics<parallel>], iteration_bounds = array<i64: 2>, scalar_prefetch = 0 : i64, scratch_operands = 0 : i64, tpu.core_type = #tpu.core_type<tc>, window_params = [{transform_indices = @transform_0, window_bounds = array<i64: 8, 64>}, {transform_indices = @transform_1, window_bounds = array<i64: 1, 1, 8>}, {pipeline_mode = #tpu.pipeline_mode<synchronous>, transform_indices = @transform_2, window_bounds = array<i64: 1, 64>}, {pipeline_mode = #tpu.pipeline_mode<synchronous>, transform_indices = @transform_3, window_bounds = array<i64: 1, 64>}, {pipeline_mode = #tpu.pipeline_mode<synchronous>, transform_indices = @transform_4, window_bounds = array<i64: 64, 192>}, {pipeline_mode = #tpu.pipeline_mode<synchronous>, transform_indices = @transform_5, window_bounds = array<i64: 1, 192>}, {pipeline_mode = #tpu.pipeline_mode<synchronous>, transform_indices = @transform_6, window_bounds = array<i64: 64, 64>}, {pipeline_mode = #tpu.pipeline_mode<synchronous>, transform_indices = @transform_7, window_bounds = array<i64: 1, 64>}, {pipeline_mode = #tpu.pipeline_mode<synchronous>, transform_indices = @transform_8, window_bounds = array<i64: 1, 64>}, {pipeline_mode = #tpu.pipeline_mode<synchronous>, transform_indices = @transform_9, window_bounds = array<i64: 1, 64>}, {pipeline_mode = #tpu.pipeline_mode<synchronous>, transform_indices = @transform_10, window_bounds = array<i64: 64, 128>}, {pipeline_mode = #tpu.pipeline_mode<synchronous>, transform_indices = @transform_11, window_bounds = array<i64: 1, 128>}, {pipeline_mode = #tpu.pipeline_mode<synchronous>, transform_indices = @transform_12, window_bounds = array<i64: 128, 64>}, {pipeline_mode = #tpu.pipeline_mode<synchronous>, transform_indices = @transform_13, window_bounds = array<i64: 1, 64>}, {pipeline_mode = #tpu.pipeline_mode<synchronous>, transform_indices = @transform_14, window_bounds = array<i64: 1, 64>}, {pipeline_mode = #tpu.pipeline_mode<synchronous>, transform_indices = @transform_15, window_bounds = array<i64: 1, 64>}, {transform_indices = @transform_16, window_bounds = array<i64: 8, 64>}]} {
    %c0 = arith.constant 0 : index
    %c0_0 = arith.constant 0 : index
    %0 = vector.load %arg1[%c0, %c0_0] : memref<8x64xf32, #tpu.memory_space<vmem>>, vector<8x64xf32>
    %1 = arith.truncf %0 : vector<8x64xf32> to vector<8x64xbf16>
    %c0_1 = arith.constant 0 : index
    %c0_2 = arith.constant 0 : index
    %2 = vector.load %arg5[%c0_1, %c0_2] : memref<64x192xbf16, #tpu.memory_space<vmem>>, vector<64x192xbf16>
    %cst = arith.constant dense<0.000000e+00> : vector<8x192xf32>
    %3 = tpu.matmul %1, %2, %cst {dimension_numbers = #tpu.dot_dimension_numbers<[1], [0], [0], [1], [0, 0, 1, 1], [], []>} : vector<8x64xbf16>, vector<64x192xbf16>, vector<8x192xf32> -> vector<8x192xf32>
    %c0_3 = arith.constant 0 : index
    %c0_4 = arith.constant 0 : index
    %4 = vector.load %arg6[%c0_3, %c0_4] : memref<1x192xf32, #tpu.memory_space<vmem>>, vector<1x192xf32>
    %5 = vector.broadcast %4 : vector<1x192xf32> to vector<8x192xf32>
    %6 = arith.addf %3, %5 : vector<8x192xf32>
    %c0_5 = arith.constant 0 : index
    %c0_6 = arith.constant 0 : index
    %c0_7 = arith.constant 0 : index
    %7 = vector.load %arg2[%c0_5, %c0_6, %c0_7] : memref<1x1x8xf32, #tpu.memory_space<vmem>>, vector<1x1x8xf32>
    %8 = vector.shape_cast %7 : vector<1x1x8xf32> to vector<1x8xf32>
    %9 = vector.extract_strided_slice %6 {offsets = [0, 0], sizes = [8, 16], strides = [1, 1]} : vector<8x192xf32> to vector<8x16xf32>
    %cst_8 = arith.constant 2.500000e-01 : f32
    %10 = vector.broadcast %cst_8 : f32 to vector<8x16xf32>
    %11 = arith.mulf %9, %10 : vector<8x16xf32>
    %12 = arith.truncf %11 : vector<8x16xf32> to vector<8x16xbf16>
    %13 = vector.extract_strided_slice %6 {offsets = [0, 64], sizes = [8, 16], strides = [1, 1]} : vector<8x192xf32> to vector<8x16xf32>
    %14 = arith.truncf %13 : vector<8x16xf32> to vector<8x16xbf16>
    %15 = vector.extract_strided_slice %6 {offsets = [0, 128], sizes = [8, 16], strides = [1, 1]} : vector<8x192xf32> to vector<8x16xf32>
    %16 = arith.truncf %15 : vector<8x16xf32> to vector<8x16xbf16>
    %cst_9 = arith.constant dense<0.000000e+00> : vector<8x8xf32>
    %17 = tpu.matmul %12, %14, %cst_9 {dimension_numbers = #tpu.dot_dimension_numbers<[1], [1], [0], [0], [0, 0, 1, 0], [], []>} : vector<8x16xbf16>, vector<8x16xbf16>, vector<8x8xf32> -> vector<8x8xf32>
    %18 = vector.broadcast %8 : vector<1x8xf32> to vector<8x8xf32>
    %19 = arith.addf %17, %18 : vector<8x8xf32>
    %cst_10 = arith.constant dense<0xFF800000> : vector<8xf32>
    %20 = vector.multi_reduction <maximumf>, %19, %cst_10 [1] : vector<8x8xf32> to vector<8xf32>
    %21 = vector.shape_cast %20 : vector<8xf32> to vector<8x1xf32>
    %22 = vector.broadcast %21 : vector<8x1xf32> to vector<8x8xf32>
    %23 = arith.subf %19, %22 : vector<8x8xf32>
    %24 = math.exp %23 : vector<8x8xf32>
    %cst_11 = arith.constant dense<0.000000e+00> : vector<8xf32>
    %25 = vector.multi_reduction <add>, %24, %cst_11 [1] : vector<8x8xf32> to vector<8xf32>
    %26 = vector.shape_cast %25 : vector<8xf32> to vector<8x1xf32>
    %27 = tpu.reciprocal %26 {approx = true} : vector<8x1xf32> -> vector<8x1xf32>
    %28 = vector.broadcast %27 : vector<8x1xf32> to vector<8x8xf32>
    %29 = arith.mulf %24, %28 : vector<8x8xf32>
    %30 = arith.truncf %29 : vector<8x8xf32> to vector<8x8xbf16>
    %cst_12 = arith.constant dense<0.000000e+00> : vector<8x16xf32>
    %31 = tpu.matmul %30, %16, %cst_12 {dimension_numbers = #tpu.dot_dimension_numbers<[1], [0], [0], [1], [0, 0, 1, 1], [], []>} : vector<8x8xbf16>, vector<8x16xbf16>, vector<8x16xf32> -> vector<8x16xf32>
    %32 = vector.extract_strided_slice %6 {offsets = [0, 16], sizes = [8, 16], strides = [1, 1]} : vector<8x192xf32> to vector<8x16xf32>
    %cst_13 = arith.constant 2.500000e-01 : f32
    %33 = vector.broadcast %cst_13 : f32 to vector<8x16xf32>
    %34 = arith.mulf %32, %33 : vector<8x16xf32>
    %35 = arith.truncf %34 : vector<8x16xf32> to vector<8x16xbf16>
    %36 = vector.extract_strided_slice %6 {offsets = [0, 80], sizes = [8, 16], strides = [1, 1]} : vector<8x192xf32> to vector<8x16xf32>
    %37 = arith.truncf %36 : vector<8x16xf32> to vector<8x16xbf16>
    %38 = vector.extract_strided_slice %6 {offsets = [0, 144], sizes = [8, 16], strides = [1, 1]} : vector<8x192xf32> to vector<8x16xf32>
    %39 = arith.truncf %38 : vector<8x16xf32> to vector<8x16xbf16>
    %cst_14 = arith.constant dense<0.000000e+00> : vector<8x8xf32>
    %40 = tpu.matmul %35, %37, %cst_14 {dimension_numbers = #tpu.dot_dimension_numbers<[1], [1], [0], [0], [0, 0, 1, 0], [], []>} : vector<8x16xbf16>, vector<8x16xbf16>, vector<8x8xf32> -> vector<8x8xf32>
    %41 = vector.broadcast %8 : vector<1x8xf32> to vector<8x8xf32>
    %42 = arith.addf %40, %41 : vector<8x8xf32>
    %cst_15 = arith.constant dense<0xFF800000> : vector<8xf32>
    %43 = vector.multi_reduction <maximumf>, %42, %cst_15 [1] : vector<8x8xf32> to vector<8xf32>
    %44 = vector.shape_cast %43 : vector<8xf32> to vector<8x1xf32>
    %45 = vector.broadcast %44 : vector<8x1xf32> to vector<8x8xf32>
    %46 = arith.subf %42, %45 : vector<8x8xf32>
    %47 = math.exp %46 : vector<8x8xf32>
    %cst_16 = arith.constant dense<0.000000e+00> : vector<8xf32>
    %48 = vector.multi_reduction <add>, %47, %cst_16 [1] : vector<8x8xf32> to vector<8xf32>
    %49 = vector.shape_cast %48 : vector<8xf32> to vector<8x1xf32>
    %50 = tpu.reciprocal %49 {approx = true} : vector<8x1xf32> -> vector<8x1xf32>
    %51 = vector.broadcast %50 : vector<8x1xf32> to vector<8x8xf32>
    %52 = arith.mulf %47, %51 : vector<8x8xf32>
    %53 = arith.truncf %52 : vector<8x8xf32> to vector<8x8xbf16>
    %cst_17 = arith.constant dense<0.000000e+00> : vector<8x16xf32>
    %54 = tpu.matmul %53, %39, %cst_17 {dimension_numbers = #tpu.dot_dimension_numbers<[1], [0], [0], [1], [0, 0, 1, 1], [], []>} : vector<8x8xbf16>, vector<8x16xbf16>, vector<8x16xf32> -> vector<8x16xf32>
    %55 = vector.extract_strided_slice %6 {offsets = [0, 32], sizes = [8, 16], strides = [1, 1]} : vector<8x192xf32> to vector<8x16xf32>
    %cst_18 = arith.constant 2.500000e-01 : f32
    %56 = vector.broadcast %cst_18 : f32 to vector<8x16xf32>
    %57 = arith.mulf %55, %56 : vector<8x16xf32>
    %58 = arith.truncf %57 : vector<8x16xf32> to vector<8x16xbf16>
    %59 = vector.extract_strided_slice %6 {offsets = [0, 96], sizes = [8, 16], strides = [1, 1]} : vector<8x192xf32> to vector<8x16xf32>
    %60 = arith.truncf %59 : vector<8x16xf32> to vector<8x16xbf16>
    %61 = vector.extract_strided_slice %6 {offsets = [0, 160], sizes = [8, 16], strides = [1, 1]} : vector<8x192xf32> to vector<8x16xf32>
    %62 = arith.truncf %61 : vector<8x16xf32> to vector<8x16xbf16>
    %cst_19 = arith.constant dense<0.000000e+00> : vector<8x8xf32>
    %63 = tpu.matmul %58, %60, %cst_19 {dimension_numbers = #tpu.dot_dimension_numbers<[1], [1], [0], [0], [0, 0, 1, 0], [], []>} : vector<8x16xbf16>, vector<8x16xbf16>, vector<8x8xf32> -> vector<8x8xf32>
    %64 = vector.broadcast %8 : vector<1x8xf32> to vector<8x8xf32>
    %65 = arith.addf %63, %64 : vector<8x8xf32>
    %cst_20 = arith.constant dense<0xFF800000> : vector<8xf32>
    %66 = vector.multi_reduction <maximumf>, %65, %cst_20 [1] : vector<8x8xf32> to vector<8xf32>
    %67 = vector.shape_cast %66 : vector<8xf32> to vector<8x1xf32>
    %68 = vector.broadcast %67 : vector<8x1xf32> to vector<8x8xf32>
    %69 = arith.subf %65, %68 : vector<8x8xf32>
    %70 = math.exp %69 : vector<8x8xf32>
    %cst_21 = arith.constant dense<0.000000e+00> : vector<8xf32>
    %71 = vector.multi_reduction <add>, %70, %cst_21 [1] : vector<8x8xf32> to vector<8xf32>
    %72 = vector.shape_cast %71 : vector<8xf32> to vector<8x1xf32>
    %73 = tpu.reciprocal %72 {approx = true} : vector<8x1xf32> -> vector<8x1xf32>
    %74 = vector.broadcast %73 : vector<8x1xf32> to vector<8x8xf32>
    %75 = arith.mulf %70, %74 : vector<8x8xf32>
    %76 = arith.truncf %75 : vector<8x8xf32> to vector<8x8xbf16>
    %cst_22 = arith.constant dense<0.000000e+00> : vector<8x16xf32>
    %77 = tpu.matmul %76, %62, %cst_22 {dimension_numbers = #tpu.dot_dimension_numbers<[1], [0], [0], [1], [0, 0, 1, 1], [], []>} : vector<8x8xbf16>, vector<8x16xbf16>, vector<8x16xf32> -> vector<8x16xf32>
    %78 = vector.extract_strided_slice %6 {offsets = [0, 48], sizes = [8, 16], strides = [1, 1]} : vector<8x192xf32> to vector<8x16xf32>
    %cst_23 = arith.constant 2.500000e-01 : f32
    %79 = vector.broadcast %cst_23 : f32 to vector<8x16xf32>
    %80 = arith.mulf %78, %79 : vector<8x16xf32>
    %81 = arith.truncf %80 : vector<8x16xf32> to vector<8x16xbf16>
    %82 = vector.extract_strided_slice %6 {offsets = [0, 112], sizes = [8, 16], strides = [1, 1]} : vector<8x192xf32> to vector<8x16xf32>
    %83 = arith.truncf %82 : vector<8x16xf32> to vector<8x16xbf16>
    %84 = vector.extract_strided_slice %6 {offsets = [0, 176], sizes = [8, 16], strides = [1, 1]} : vector<8x192xf32> to vector<8x16xf32>
    %85 = arith.truncf %84 : vector<8x16xf32> to vector<8x16xbf16>
    %cst_24 = arith.constant dense<0.000000e+00> : vector<8x8xf32>
    %86 = tpu.matmul %81, %83, %cst_24 {dimension_numbers = #tpu.dot_dimension_numbers<[1], [1], [0], [0], [0, 0, 1, 0], [], []>} : vector<8x16xbf16>, vector<8x16xbf16>, vector<8x8xf32> -> vector<8x8xf32>
    %87 = vector.broadcast %8 : vector<1x8xf32> to vector<8x8xf32>
    %88 = arith.addf %86, %87 : vector<8x8xf32>
    %cst_25 = arith.constant dense<0xFF800000> : vector<8xf32>
    %89 = vector.multi_reduction <maximumf>, %88, %cst_25 [1] : vector<8x8xf32> to vector<8xf32>
    %90 = vector.shape_cast %89 : vector<8xf32> to vector<8x1xf32>
    %91 = vector.broadcast %90 : vector<8x1xf32> to vector<8x8xf32>
    %92 = arith.subf %88, %91 : vector<8x8xf32>
    %93 = math.exp %92 : vector<8x8xf32>
    %cst_26 = arith.constant dense<0.000000e+00> : vector<8xf32>
    %94 = vector.multi_reduction <add>, %93, %cst_26 [1] : vector<8x8xf32> to vector<8xf32>
    %95 = vector.shape_cast %94 : vector<8xf32> to vector<8x1xf32>
    %96 = tpu.reciprocal %95 {approx = true} : vector<8x1xf32> -> vector<8x1xf32>
    %97 = vector.broadcast %96 : vector<8x1xf32> to vector<8x8xf32>
    %98 = arith.mulf %93, %97 : vector<8x8xf32>
    %99 = arith.truncf %98 : vector<8x8xf32> to vector<8x8xbf16>
    %cst_27 = arith.constant dense<0.000000e+00> : vector<8x16xf32>
    %100 = tpu.matmul %99, %85, %cst_27 {dimension_numbers = #tpu.dot_dimension_numbers<[1], [0], [0], [1], [0, 0, 1, 1], [], []>} : vector<8x8xbf16>, vector<8x16xbf16>, vector<8x16xf32> -> vector<8x16xf32>
    %101 = tpu.concatenate %31, %54, %77, %100 in 1 : vector<8x16xf32>, vector<8x16xf32>, vector<8x16xf32>, vector<8x16xf32> -> vector<8x64xf32>
    %102 = arith.truncf %101 : vector<8x64xf32> to vector<8x64xbf16>
    %c0_28 = arith.constant 0 : index
    %c0_29 = arith.constant 0 : index
    %103 = vector.load %arg7[%c0_28, %c0_29] : memref<64x64xbf16, #tpu.memory_space<vmem>>, vector<64x64xbf16>
    %cst_30 = arith.constant dense<0.000000e+00> : vector<8x64xf32>
    %104 = tpu.matmul %102, %103, %cst_30 {dimension_numbers = #tpu.dot_dimension_numbers<[1], [0], [0], [1], [0, 0, 1, 1], [], []>} : vector<8x64xbf16>, vector<64x64xbf16>, vector<8x64xf32> -> vector<8x64xf32>
    %c0_31 = arith.constant 0 : index
    %c0_32 = arith.constant 0 : index
    %105 = vector.load %arg8[%c0_31, %c0_32] : memref<1x64xf32, #tpu.memory_space<vmem>>, vector<1x64xf32>
    %106 = vector.broadcast %105 : vector<1x64xf32> to vector<8x64xf32>
    %107 = arith.addf %104, %106 : vector<8x64xf32>
    %108 = arith.addf %0, %107 : vector<8x64xf32>
    %c0_33 = arith.constant 0 : index
    %c0_34 = arith.constant 0 : index
    %109 = vector.load %arg9[%c0_33, %c0_34] : memref<1x64xf32, #tpu.memory_space<vmem>>, vector<1x64xf32>
    %c0_35 = arith.constant 0 : index
    %c0_36 = arith.constant 0 : index
    %110 = vector.load %arg10[%c0_35, %c0_36] : memref<1x64xf32, #tpu.memory_space<vmem>>, vector<1x64xf32>
    %cst_37 = arith.constant dense<0.000000e+00> : vector<8xf32>
    %111 = vector.multi_reduction <add>, %108, %cst_37 [1] : vector<8x64xf32> to vector<8xf32>
    %112 = vector.shape_cast %111 : vector<8xf32> to vector<8x1xf32>
    %cst_38 = arith.constant 6.400000e+01 : f32
    %113 = vector.broadcast %cst_38 : f32 to vector<8x1xf32>
    %114 = arith.divf %112, %113 : vector<8x1xf32>
    %115 = vector.broadcast %114 : vector<8x1xf32> to vector<8x64xf32>
    %116 = arith.subf %108, %115 : vector<8x64xf32>
    %117 = arith.mulf %116, %116 : vector<8x64xf32>
    %cst_39 = arith.constant dense<0.000000e+00> : vector<8xf32>
    %118 = vector.multi_reduction <add>, %117, %cst_39 [1] : vector<8x64xf32> to vector<8xf32>
    %119 = vector.shape_cast %118 : vector<8xf32> to vector<8x1xf32>
    %cst_40 = arith.constant 6.400000e+01 : f32
    %120 = vector.broadcast %cst_40 : f32 to vector<8x1xf32>
    %121 = arith.divf %119, %120 : vector<8x1xf32>
    %cst_41 = arith.constant 9.99999996E-13 : f32
    %122 = vector.broadcast %cst_41 : f32 to vector<8x1xf32>
    %123 = arith.addf %121, %122 : vector<8x1xf32>
    %124 = math.rsqrt %123 : vector<8x1xf32>
    %125 = vector.broadcast %124 : vector<8x1xf32> to vector<8x64xf32>
    %126 = arith.mulf %116, %125 : vector<8x64xf32>
    %127 = vector.broadcast %109 : vector<1x64xf32> to vector<8x64xf32>
    %128 = arith.mulf %126, %127 : vector<8x64xf32>
    %129 = vector.broadcast %110 : vector<1x64xf32> to vector<8x64xf32>
    %130 = arith.addf %128, %129 : vector<8x64xf32>
    %131 = arith.truncf %130 : vector<8x64xf32> to vector<8x64xbf16>
    %c0_42 = arith.constant 0 : index
    %c0_43 = arith.constant 0 : index
    %132 = vector.load %arg11[%c0_42, %c0_43] : memref<64x128xbf16, #tpu.memory_space<vmem>>, vector<64x128xbf16>
    %cst_44 = arith.constant dense<0.000000e+00> : vector<8x128xf32>
    %133 = tpu.matmul %131, %132, %cst_44 {dimension_numbers = #tpu.dot_dimension_numbers<[1], [0], [0], [1], [0, 0, 1, 1], [], []>} : vector<8x64xbf16>, vector<64x128xbf16>, vector<8x128xf32> -> vector<8x128xf32>
    %c0_45 = arith.constant 0 : index
    %c0_46 = arith.constant 0 : index
    %134 = vector.load %arg12[%c0_45, %c0_46] : memref<1x128xf32, #tpu.memory_space<vmem>>, vector<1x128xf32>
    %135 = vector.broadcast %134 : vector<1x128xf32> to vector<8x128xf32>
    %136 = arith.addf %133, %135 : vector<8x128xf32>
    %cst_47 = arith.constant 5.000000e-01 : f32
    %137 = vector.broadcast %cst_47 : f32 to vector<8x128xf32>
    %138 = arith.mulf %137, %136 : vector<8x128xf32>
    %cst_48 = arith.constant 4.471500e-02 : f32
    %139 = vector.broadcast %cst_48 : f32 to vector<8x128xf32>
    %140 = arith.mulf %139, %136 : vector<8x128xf32>
    %141 = arith.mulf %140, %136 : vector<8x128xf32>
    %142 = arith.mulf %141, %136 : vector<8x128xf32>
    %143 = arith.addf %136, %142 : vector<8x128xf32>
    %cst_49 = arith.constant 0.797884583 : f32
    %144 = vector.broadcast %cst_49 : f32 to vector<8x128xf32>
    %145 = arith.mulf %144, %143 : vector<8x128xf32>
    %146 = math.tanh %145 : vector<8x128xf32>
    %cst_50 = arith.constant 1.000000e+00 : f32
    %147 = vector.broadcast %cst_50 : f32 to vector<8x128xf32>
    %148 = arith.addf %147, %146 : vector<8x128xf32>
    %149 = arith.mulf %138, %148 : vector<8x128xf32>
    %150 = arith.truncf %149 : vector<8x128xf32> to vector<8x128xbf16>
    %c0_51 = arith.constant 0 : index
    %c0_52 = arith.constant 0 : index
    %151 = vector.load %arg13[%c0_51, %c0_52] : memref<128x64xbf16, #tpu.memory_space<vmem>>, vector<128x64xbf16>
    %cst_53 = arith.constant dense<0.000000e+00> : vector<8x64xf32>
    %152 = tpu.matmul %150, %151, %cst_53 {dimension_numbers = #tpu.dot_dimension_numbers<[1], [0], [0], [1], [0, 0, 1, 1], [], []>} : vector<8x128xbf16>, vector<128x64xbf16>, vector<8x64xf32> -> vector<8x64xf32>
    %c0_54 = arith.constant 0 : index
    %c0_55 = arith.constant 0 : index
    %153 = vector.load %arg14[%c0_54, %c0_55] : memref<1x64xf32, #tpu.memory_space<vmem>>, vector<1x64xf32>
    %154 = vector.broadcast %153 : vector<1x64xf32> to vector<8x64xf32>
    %155 = arith.addf %152, %154 : vector<8x64xf32>
    %156 = arith.addf %130, %155 : vector<8x64xf32>
    %c0_56 = arith.constant 0 : index
    %c0_57 = arith.constant 0 : index
    %157 = vector.load %arg15[%c0_56, %c0_57] : memref<1x64xf32, #tpu.memory_space<vmem>>, vector<1x64xf32>
    %c0_58 = arith.constant 0 : index
    %c0_59 = arith.constant 0 : index
    %158 = vector.load %arg16[%c0_58, %c0_59] : memref<1x64xf32, #tpu.memory_space<vmem>>, vector<1x64xf32>
    %cst_60 = arith.constant dense<0.000000e+00> : vector<8xf32>
    %159 = vector.multi_reduction <add>, %156, %cst_60 [1] : vector<8x64xf32> to vector<8xf32>
    %160 = vector.shape_cast %159 : vector<8xf32> to vector<8x1xf32>
    %cst_61 = arith.constant 6.400000e+01 : f32
    %161 = vector.broadcast %cst_61 : f32 to vector<8x1xf32>
    %162 = arith.divf %160, %161 : vector<8x1xf32>
    %163 = vector.broadcast %162 : vector<8x1xf32> to vector<8x64xf32>
    %164 = arith.subf %156, %163 : vector<8x64xf32>
    %165 = arith.mulf %164, %164 : vector<8x64xf32>
    %cst_62 = arith.constant dense<0.000000e+00> : vector<8xf32>
    %166 = vector.multi_reduction <add>, %165, %cst_62 [1] : vector<8x64xf32> to vector<8xf32>
    %167 = vector.shape_cast %166 : vector<8xf32> to vector<8x1xf32>
    %cst_63 = arith.constant 6.400000e+01 : f32
    %168 = vector.broadcast %cst_63 : f32 to vector<8x1xf32>
    %169 = arith.divf %167, %168 : vector<8x1xf32>
    %cst_64 = arith.constant 9.99999996E-13 : f32
    %170 = vector.broadcast %cst_64 : f32 to vector<8x1xf32>
    %171 = arith.addf %169, %170 : vector<8x1xf32>
    %172 = math.rsqrt %171 : vector<8x1xf32>
    %173 = vector.broadcast %172 : vector<8x1xf32> to vector<8x64xf32>
    %174 = arith.mulf %164, %173 : vector<8x64xf32>
    %175 = vector.broadcast %157 : vector<1x64xf32> to vector<8x64xf32>
    %176 = arith.mulf %174, %175 : vector<8x64xf32>
    %177 = vector.broadcast %158 : vector<1x64xf32> to vector<8x64xf32>
    %178 = arith.addf %176, %177 : vector<8x64xf32>
    %c0_65 = arith.constant 0 : index
    %c0_66 = arith.constant 0 : index
    %179 = vector.load %arg17[%c0_65, %c0_66] : memref<8x64xf32, #tpu.memory_space<vmem>>, vector<8x64xf32>
    tpu.vector_store %arg17[%c0_65, %c0_66], %178 {strides = array<i32>} : memref<8x64xf32, #tpu.memory_space<vmem>>, vector<8x64xf32>,
    return
  }
  func.func @transform_0(%arg0: i32) -> (i32, i32) {
    %c0_i32 = arith.constant 0 : i32
    %c0_i32_0 = arith.constant 0 : i32
    return %arg0, %c0_i32 : i32, i32
  }
  func.func @transform_1(%arg0: i32) -> (i32, i32, i32) {
    %c0_i32 = arith.constant 0 : i32
    %c0_i32_0 = arith.constant 0 : i32
    %c0_i32_1 = arith.constant 0 : i32
    return %arg0, %c0_i32, %c0_i32_0 : i32, i32, i32
  }
  func.func @transform_2(%arg0: i32) -> (i32, i32) {
    %c0_i32 = arith.constant 0 : i32
    %c0_i32_0 = arith.constant 0 : i32
    %c0_i32_1 = arith.constant 0 : i32
    return %c0_i32, %c0_i32_0 : i32, i32
  }
  func.func @transform_3(%arg0: i32) -> (i32, i32) {
    %c0_i32 = arith.constant 0 : i32
    %c0_i32_0 = arith.constant 0 : i32
    %c0_i32_1 = arith.constant 0 : i32
    return %c0_i32, %c0_i32_0 : i32, i32
  }
  func.func @transform_4(%arg0: i32) -> (i32, i32) {
    %c0_i32 = arith.constant 0 : i32
    %c0_i32_0 = arith.constant 0 : i32
    %c0_i32_1 = arith.constant 0 : i32
    return %c0_i32, %c0_i32_0 : i32, i32
  }
  func.func @transform_5(%arg0: i32) -> (i32, i32) {
    %c0_i32 = arith.constant 0 : i32
    %c0_i32_0 = arith.constant 0 : i32
    %c0_i32_1 = arith.constant 0 : i32
    return %c0_i32, %c0_i32_0 : i32, i32
  }
  func.func @transform_6(%arg0: i32) -> (i32, i32) {
    %c0_i32 = arith.constant 0 : i32
    %c0_i32_0 = arith.constant 0 : i32
    %c0_i32_1 = arith.constant 0 : i32
    return %c0_i32, %c0_i32_0 : i32, i32
  }
  func.func @transform_7(%arg0: i32) -> (i32, i32) {
    %c0_i32 = arith.constant 0 : i32
    %c0_i32_0 = arith.constant 0 : i32
    %c0_i32_1 = arith.constant 0 : i32
    return %c0_i32, %c0_i32_0 : i32, i32
  }
  func.func @transform_8(%arg0: i32) -> (i32, i32) {
    %c0_i32 = arith.constant 0 : i32
    %c0_i32_0 = arith.constant 0 : i32
    %c0_i32_1 = arith.constant 0 : i32
    return %c0_i32, %c0_i32_0 : i32, i32
  }
  func.func @transform_9(%arg0: i32) -> (i32, i32) {
    %c0_i32 = arith.constant 0 : i32
    %c0_i32_0 = arith.constant 0 : i32
    %c0_i32_1 = arith.constant 0 : i32
    return %c0_i32, %c0_i32_0 : i32, i32
  }
  func.func @transform_10(%arg0: i32) -> (i32, i32) {
    %c0_i32 = arith.constant 0 : i32
    %c0_i32_0 = arith.constant 0 : i32
    %c0_i32_1 = arith.constant 0 : i32
    return %c0_i32, %c0_i32_0 : i32, i32
  }
  func.func @transform_11(%arg0: i32) -> (i32, i32) {
    %c0_i32 = arith.constant 0 : i32
    %c0_i32_0 = arith.constant 0 : i32
    %c0_i32_1 = arith.constant 0 : i32
    return %c0_i32, %c0_i32_0 : i32, i32
  }
  func.func @transform_12(%arg0: i32) -> (i32, i32) {
    %c0_i32 = arith.constant 0 : i32
    %c0_i32_0 = arith.constant 0 : i32
    %c0_i32_1 = arith.constant 0 : i32
    return %c0_i32, %c0_i32_0 : i32, i32
  }
  func.func @transform_13(%arg0: i32) -> (i32, i32) {
    %c0_i32 = arith.constant 0 : i32
    %c0_i32_0 = arith.constant 0 : i32
    %c0_i32_1 = arith.constant 0 : i32
    return %c0_i32, %c0_i32_0 : i32, i32
  }
  func.func @transform_14(%arg0: i32) -> (i32, i32) {
    %c0_i32 = arith.constant 0 : i32
    %c0_i32_0 = arith.constant 0 : i32
    %c0_i32_1 = arith.constant 0 : i32
    return %c0_i32, %c0_i32_0 : i32, i32
  }
  func.func @transform_15(%arg0: i32) -> (i32, i32) {
    %c0_i32 = arith.constant 0 : i32
    %c0_i32_0 = arith.constant 0 : i32
    %c0_i32_1 = arith.constant 0 : i32
    return %c0_i32, %c0_i32_0 : i32, i32
  }
  func.func @transform_16(%arg0: i32) -> (i32, i32) {
    %c0_i32 = arith.constant 0 : i32
    %c0_i32_0 = arith.constant 0 : i32
    return %arg0, %c0_i32 : i32, i32
  }
}

</mosaic_0001>

<bundles_post_ra>
// kernel: text_encoder_forward.2
= control target key start
LH: loop header
LB: loop body
LE: loop exit
PB: predicated region body
PF: predicated region fallthrough
CT: control target
= control target key end

     0   :  { %s1903_s21 = smov 0   ;;  %s2137_s0 = inlined_call_operand.vmem [shape: f32[16,64], index: 0, kind: input, shape index: {}]   ;;  %s2138_s1 = inlined_call_operand.vmem [shape: f32[2,1,8], index: 1, kind: input, shape index: {}]   ;;  %s2139_s2 = inlined_call_operand.vmem [shape: f32[1,64], index: 2, kind: input, shape index: {}]   ;;  %s2140_s3 = inlined_call_operand.vmem [shape: f32[1,64], index: 3, kind: input, shape index: {}]   ;;  %s2141_s4 = inlined_call_operand.vmem [shape: bf16[64,192], index: 4, kind: input, shape index: {}]   ;;  %s2142_s5 = inlined_call_operand.vmem [shape: f32[1,192], index: 5, kind: input, shape index: {}]   ;;  %s2143_s6 = inlined_call_operand.vmem [shape: bf16[64,64], index: 6, kind: input, shape index: {}]   ;;  %s2144_s7 = inlined_call_operand.vmem [shape: f32[1,64], index: 7, kind: input, shape index: {}]   ;;  %s2145_s8 = inlined_call_operand.vmem [shape: f32[1,64], index: 8, kind: input, shape index: {}]   ;;  %s2146_s9 = inlined_call_operand.vmem [shape: f32[1,64], index: 9, kind: input, shape index: {}]   ;;  %s2147_s10 = inlined_call_operand.vmem [shape: bf16[64,128], index: 10, kind: input, shape index: {}]   ;;  %s2148_s11 = inlined_call_operand.vmem [shape: f32[1,128], index: 11, kind: input, shape index: {}]   ;;  %s2149_s12 = inlined_call_operand.vmem [shape: bf16[128,64], index: 12, kind: input, shape index: {}]   ;;  %s2150_s13 = inlined_call_operand.vmem [shape: f32[1,64], index: 13, kind: input, shape index: {}]   ;;  %s2151_s14 = inlined_call_operand.vmem [shape: f32[1,64], index: 14, kind: input, shape index: {}]   ;;  %s2152_s15 = inlined_call_operand.vmem [shape: f32[1,64], index: 15, kind: input, shape index: {}]   ;;  %s2153_s16 = inlined_call_operand.vmem [shape: f32[16,64], index: 16, kind: output, shape index: {}]  }
   0x1   :  { %2154 = sst [smem:[#allocation2_spill]] %s2137_s0 }
   0x2 LB: > { %s1549_s22 = sadd.s32 4294967295, %s1806_s21   ;;  %p1553_p0 = scmp.ge.s32.totalorder %s1806_s21, 1  ;;  %s1806_s21 = sphi %s1903_s21, %s26_s21  }
   0x3   : > { %p469_p1 = scmp.lt.s32.totalorder %s1806_s21, 3 }
   0x5   : > { %p470_p2 = pnand %p1553_p0, %p469_p1 }
   0x6   : > { %p520_p3 = scmp.lt.s32.totalorder (!%p470_p2), %s1549_s22, 1  ;;  %vm535_vm0 = vcmask (!%p470_p2), 523264   ;;  %s2155_s26 = sld [smem:[#allocation2_spill]] (!%p470_p2)  ;;  %v1748_v7 = vld [vmem:[%s2141_s4 + $0x4] ss:$8 sps:$4 sm:$0xff] (!%p470_p2)   ;;  %v1808_v15 = vmov (!%p470_p2), 0   ;;  %v575_v26 = vlaneseq (!%p470_p2) }
   0x7   : > { %473 = sbr.rel (%p470_p2) target bundleno = 2895 (0xb4f), region = 84  ;;  %v1750_v8 = vld [vmem:[%s2141_s4] ss:$8 sps:$4 sm:$0xff] (!%p470_p2)   ;;  %628 = vmatprep.subr.bf16.mxu1 (!%p470_p2), %v1748_v7  ;;  %v1751_v9 = vld [vmem:[%s2141_s4 + $0x14] ss:$8 sps:$4 sm:$0xff] (!%p470_p2)   ;;  %660 = vmatprep.mubr.bf16.mxu1 (!%p470_p2), %v1808_v15  ;;  %v1809_v28 = vmov (!%p470_p2), 0.0  }
   0x8   : > { %629 = vmatpush1.bf16.msra.mxu1 (!%p470_p2), %v1750_v8  ;;  %v1753_v10 = vld [vmem:[%s2141_s4 + $0x10] ss:$8 sps:$4 sm:$0xff] (!%p470_p2)   ;;  %v1754_v11 = vld [vmem:[%s2141_s4 + $0x24] ss:$8 sps:$4 sm:$0xff] (!%p470_p2)   ;;  %v1756_v12 = vld [vmem:[%s2141_s4 + $0x20] ss:$8 sps:$4 sm:$0xff] (!%p470_p2)   ;;  %1650 = vmatprep.subr.bf16.mxu0 (!%p470_p2), %v1809_v28 }
   0x9   : > { %630 = vmatprep.subr.bf16.mxu1 (!%p470_p2), %v1751_v9  ;;  %v1757_v13 = vld [vmem:[%s2141_s4 + $0x34] ss:$8 sps:$4 sm:$0xff] (!%p470_p2)   ;;  %v1759_v14 = vld [vmem:[%s2141_s4 + $0x30] ss:$8 sps:$4 sm:$0xff] (!%p470_p2)   ;;  %v1556_v20 = vld [vmem:[%s2139_s2] ss:$0 sm:$0xff] (!%p470_p2) }
   0xa   : > { %v1557_v22 = vld [vmem:[%s2140_s3] ss:$0 sm:$0xff] (!%p470_p2)  ;;  %v576_v27 = vshrl.u32 (!%p470_p2), %v575_v26, 7  ;;  %vm1810_vm1 = vmmov (!%p470_p2), 0   ;;  %s1813_s28 = smov (!%p470_p2), 48   ;;  %s1814_s29 = smov (!%p470_p2), 32  }
   0xb   : > { %v573_v30 = vld [vmem:[%s2142_s5] sm:$0x3] (!%p470_p2)  ;;  %1652 = vmatprep.mubr.msk.bf16.mxu0 (!%p470_p2), %vm1810_vm1, %v1809_v28  ;;  %s1815_s30 = smov (!%p470_p2), 96   ;;  %s1816_s0 = smov (!%p470_p2), 16   ;;  %vm683_vm2 = vcmask (!%p470_p2), 130048   ;;  %vm746_vm3 = vcmask (!%p470_p2), 1043456  }
   0xc   : > { %631 = vmatpush1.bf16.msra.mxu1 (!%p470_p2), %v1753_v10  ;;  %v577_v29 = vsub.s32 (!%p470_p2), 0, %v576_v27  ;;  %s1817_s17 = smov (!%p470_p2), 80   ;;  %v581_v40 = vsub.s32 (!%p470_p2), 1, %v576_v27  ;;  %vm730_vm4 = vcmask (!%p470_p2), 64512   ;;  %vm1135_vm5 = vcmask (!%p470_p2), 261120  }
   0xd   : > { %632 = vmatprep.subr.bf16.mxu1 (!%p470_p2), %v1754_v11  ;;  %vm1137_vm6 = vcmask (!%p470_p2), 392192  }
   0xe   : > { %s2157_s22 = smov (!%p520_p3, %s1549_s22), 1  ;;  %v578_v31 = vrot.slane %v573_v30, %v577_v29  ;;  %v582_v41 = vrot.slane %v573_v30, %v581_v40 }
   0xf   : > { %s1554_s23 = sshll.u32 %s2157_s22, 3  ;;  %s526_s20 = scalar_lea.vmem %s2138_s1, %s2157_s22 }
  0x10   : > { %s523_s27 = scalar_lea.vmem %s2155_s26, %s1554_s23  ;;  %633 = vmatpush1.bf16.msra.mxu1 %v1756_v12  ;;  %s1811_s26 = smov 64   ;;  %v1567_v56 = vld [vmem:[%s526_s20] ss:$0 sm:$0xff] }
  0x11   : > { %v532_v0 = vld [vmem:[%s523_s27] sm:$0xff]  ;;  %634 = vmatprep.subr.bf16.mxu1 %v1757_v13  ;;  %s1812_s27 = smov 112   ;;  %s530_s24 = scalar_lea.vmem %s2153_s16, %s1554_s23 }
  0x12   : > { %v536_v1 = vsel %vm535_vm0, %v532_v0, 0.0 }
  0x13   : > { %537 = vadd.xlane.f32.xlu0 %v536_v1 }
  0x14   : > { %635 = vmatpush1.bf16.msra.mxu1 %v1759_v14 }
  0x15   : > { %1638 = vmatprep.subr.bf16.mxu1 %v1809_v28 }
  0xa0   : > { %v538_v2 = vpop.xlane.xlu0 %537 }
  0xa1   : > { %v540_v3 = vmul.f32 0.015625, %v538_v2 }
  0xa3   : > { %v541_v4 = vsub.f32 %v532_v0, %v540_v3 }
  0xa5   : > { %v542_v5 = vmul.f32 %v541_v4, %v541_v4 }
  0xa7   : > { %v543_v6 = vsel %vm535_vm0, %v542_v5, 0.0 }
  0xa8   : > { %544 = vadd.xlane.f32.xlu0 %v543_v6 }
 0x135   : > { %v545_v16 = vpop.xlane.xlu0 %544 }
 0x136   : > { %v546_v17 = vmul.f32 0.015625, %v545_v16 }
 0x138   : > { %v547_v18 = vadd.f32 1e-12, %v546_v17 }
 0x13a   : > { %1776 = vrsqrt.f32 %v547_v18 }
 0x144   : > { %v1777_v19 = vpop.eup %1776 }
 0x145   : > { %v549_v21 = vmul.f32 %v1777_v19, %v541_v4 }
 0x147   : > { %v556_v23 = vmul.f32 %v1556_v20, %v549_v21 }
 0x149   : > { %v1951_v24 = vadd.f32 %v1557_v22, %v556_v23 }
 0x14b   : > { %v564_v25 = vpack.c.bf16 %v1951_v24, %v1951_v24 }
 0x14d   : > { %1566 = vmatmul.mubr.msk.bf16.vlgmr.msra.gmra.mrb[0].mxu1 %vm535_vm0, %v564_v25 }
 0x14e   : > { %1640 = vmatprep.mubr.msk.bf16.mxu1 %vm1810_vm1, %v1809_v28 }
 0x220   : > { %v662_v32 = vpop.f32.mrb[0].mxu1 }
 0x221   : > { %v663_v33 = vadd.f32 %v662_v32, %v578_v31  ;;  %v664_v34 = vpop.f32.mrb[1].mxu1 }
 0x222   : > { %v666_v35 = vpop.f32.mrb[2].mxu1  ;;  %v665_v43 = vadd.f32 %v664_v34, %v582_v41 }
 0x223   : > { %v670_v36 = vmul.f32 0.25, %v663_v33  ;;  %v672_v37 = vpack.c.bf16 %v663_v33, %v663_v33  ;;  %v667_v38 = vpop.f32.mrb[3].mxu1 }
 0x224   : > { %v1973_v46 = vpack.c.bf16 %v665_v43, %v665_v43 }
 0x225   : > { %v671_v39 = vpack.c.bf16 %v670_v36, %v670_v36  ;;  %681 = vrot.lane.b32.xlu1 %v672_v37, %s1811_s26 }
 0x226   : > { %v748_v49 = vsel %vm746_vm3, %v1973_v46, 0 }
 0x227   : > { %791 = vrot.lane.b32.xlu0 %v671_v39, %s1812_s27 }
 0x229   : > { %793 = vrot.lane.b32.xlu1 %v672_v37, %s1813_s28 }
 0x22d   : > { %904 = vrot.lane.b32.xlu1 %v672_v37, %s1814_s29 }
 0x231   : > { %902 = vrot.lane.b32.xlu1 %v671_v39, %s1815_s30 }
 0x235   : > { %1014 = vrot.lane.b32.xlu1 %v672_v37, %s1816_s0 }
 0x239   : > { %1012 = vrot.lane.b32.xlu1 %v671_v39, %s1817_s17 }
 0x297   : > { %v682_v42 = vpop.permute.xlu1 %681 }
 0x298   : > { %v688_v44 = vsel %vm683_vm2, %v682_v42, 0 }
 0x299   : > { %1639 = vmatpush3.bf16.xpose.msra.mxu1 %v688_v44  ;;  %v792_v50 = vpop.permute.xlu0 %791 }
 0x29a   : > { %1644 = vmatprep.subr.bf16.mxu1 %v1809_v28 }
 0x29b   : > { %v794_v45 = vpop.permute.xlu1 %793 }
 0x29c   : > { %v799_v47 = vsel %vm683_vm2, %v794_v45, 0 }
 0x29d   : > { %1651 = vmatpush3.bf16.xpose.msra.mxu0 %v799_v47 }
 0x29e   : > { %1662 = vmatprep.subr.bf16.mxu0 %v1809_v28 }
 0x29f   : > { %v905_v48 = vpop.permute.xlu1 %904 }
 0x2a0   : > { %1641 = vmatmul.mubr.msk.bf16.vlgmr.msra.gmra.mrb[4].mxu1 %vm683_vm2, %v671_v39  ;;  %v910_v52 = vsel %vm683_vm2, %v905_v48, 0 }
 0x2a1   : > { %1645 = vmatpush3.bf16.msra.mxu1 %v748_v49  ;;  %1646 = vmatprep.mubr.msk.bf16.mxu1 %vm1810_vm1, %v1809_v28 }
 0x2a2   : > { %1656 = vmatprep.subr.bf16.mxu1 %v1809_v28 }
 0x2a3   : > { %v903_v51 = vpop.permute.xlu1 %902 }
 0x2a4   : > { %1653 = vmatmul.mubr.msk.bf16.vlgmr.msra.gmra.mrb[0].mxu0 %vm683_vm2, %v792_v50 }
 0x2a5   : > { %1663 = vmatpush3.bf16.xpose.msra.mxu0 %v910_v52  ;;  %1664 = vmatprep.mubr.msk.bf16.mxu0 %vm1810_vm1, %v1809_v28 }
 0x2a6   : > { %1674 = vmatprep.subr.bf16.mxu0 %v1809_v28 }
 0x2a7   : > { %v1015_v53 = vpop.permute.xlu1 %1014 }
 0x2a8   : > { %v1020_v54 = vsel %vm683_vm2, %v1015_v53, 0 }
 0x2ab   : > { %v1013_v55 = vpop.permute.xlu1 %1012 }
 0x2ac   : > { %1665 = vmatmul.mubr.msk.bf16.vlgmr.msra.gmra.mrb[4].mxu0 %vm683_vm2, %v903_v51 }
 0x2ad   : > { %1675 = vmatpush3.bf16.xpose.msra.mxu0 %v1020_v54  ;;  %1676 = vmatprep.mubr.msk.bf16.mxu0 %vm1810_vm1, %v1809_v28 }
 0x2ae   : > { %1686 = vmatprep.subr.bf16.mxu0 %v1809_v28 }
 0x2b4   : > { %1677 = vmatmul.mubr.msk.bf16.vlgmr.msra.gmra.mrb[8].mxu0 %vm683_vm2, %v1013_v55 }
 0x2b5   : > { %1694 = vmatprep.mubr.msk.bf16.mxu0 %vm1810_vm1, %v1809_v28 }
 0x373   : > { %v724_v57 = vpop.f32.mrb[4].mxu1 }
 0x374   : > { %v725_v58 = vadd.f32 %v1567_v56, %v724_v57  ;;  %v1642_v59 = vpop.f32.mrb[5].mxu1 }
 0x375   : > { %v727_v60 = vpop.f32.mrb[6].mxu1 }
 0x376   : > { %v1643_v61 = vpop.f32.mrb[7].mxu1  ;;  %v731_v62 = vsel %vm730_vm4, %v725_v58, -inf }
 0x377   : > { %v835_v63 = vpop.f32.mrb[0].mxu0  ;;  %732 = vmax.xlane.f32.xlu1 %v731_v62  ;;  %v1760_v61 = vld [vmem:[%s2143_s6] sm:$0xff]  }
 0x378   : > { %v836_v0 = vadd.f32 %v1567_v56, %v835_v63  ;;  %v1654_v1 = vpop.f32.mrb[1].mxu0  ;;  %1687 = vmatpush3.bf16.msra.mxu0 %v1760_v61 }
 0x379   : > { %v838_v2 = vpop.f32.mrb[2].mxu0  ;;  %1688 = vmatprep.subr.bf16.mxu0 %v1809_v28 }
 0x37a   : > { %v1655_v3 = vpop.f32.mrb[3].mxu0  ;;  %v841_v4 = vsel %vm730_vm4, %v836_v0, -inf }
 0x37b   : > { %842 = vmax.xlane.f32.xlu0 %v841_v4 }
 0x37f   : > { %v946_v5 = vpop.f32.mrb[4].mxu0 }
 0x380   : > { %v947_v6 = vadd.f32 %v1567_v56, %v946_v5  ;;  %v1666_v7 = vpop.f32.mrb[5].mxu0 }
 0x381   : > { %v949_v8 = vpop.f32.mrb[6].mxu0  ;;  %v1762_v7 = vld [vmem:[%s2143_s6 + $0x10] sm:$0xff]  }
 0x382   : > { %v1667_v9 = vpop.f32.mrb[7].mxu0  ;;  %v952_v10 = vsel %vm730_vm4, %v947_v6, -inf  ;;  %v1763_v8 = vld [vmem:[%s2143_s6 + $0x18] sm:$0xff]  }
 0x383   : > { %953 = vmax.xlane.f32.xlu1 %v952_v10 }
 0x387   : > { %v1056_v11 = vpop.f32.mrb[8].mxu0 }
 0x388   : > { %v1057_v12 = vadd.f32 %v1567_v56, %v1056_v11  ;;  %v1678_v13 = vpop.f32.mrb[9].mxu0 }
 0x389   : > { %v1059_v14 = vpop.f32.mrb[10].mxu0 }
 0x38a   : > { %v1679_v15 = vpop.f32.mrb[11].mxu0  ;;  %v1062_v16 = vsel %vm730_vm4, %v1057_v12, -inf }
 0x38b   : > { %1063 = vmax.xlane.f32.xlu0 %v1062_v16 }
 0x404   : > { %v733_v17 = vpop.xlane.xlu1 %732 }
 0x405   : > { %v734_v18 = vsub.f32 %v725_v58, %v733_v17 }
 0x407   : > { %v735_v19 = vmul.f32 1.442695, %v734_v18 }
 0x408   : > { %v843_v20 = vpop.xlane.xlu0 %842 }
 0x409   : > { %1778 = vpow2.f32 %v735_v19  ;;  %v844_v21 = vsub.f32 %v836_v0, %v843_v20 }
 0x40b   : > { %v845_v22 = vmul.f32 1.442695, %v844_v21 }
 0x40d   : > { %1780 = vpow2.f32 %v845_v22 }
 0x410   : > { %v954_v34 = vpop.xlane.xlu1 %953 }
 0x411   : > { %v955_v35 = vsub.f32 %v947_v6, %v954_v34  ;;  %v1761_v6 = vld [vmem:[%s2143_s6 + $0x8] sm:$0xff]  }
 0x412   : > { %1689 = vmatpush3.bf16.msra.mxu0 %v1761_v6 }
 0x413   : > { %v1779_v23 = vpop.eup %1778  ;;  %v956_v36 = vmul.f32 1.442695, %v955_v35  ;;  %1690 = vmatprep.subr.bf16.mxu0 %v1809_v28 }
 0x414   : > { %v737_v25 = vsel %vm730_vm4, %v1779_v23, 0.0 }
 0x415   : > { %738 = vadd.xlane.f32.xlu1 %v737_v25  ;;  %v1576_v25 = vld [vmem:[%s2144_s7] ss:$0 sm:$0xff] }
 0x416   : > { %1691 = vmatpush3.bf16.msra.mxu0 %v1762_v7 }
 0x417   : > { %v1781_v26 = vpop.eup %1780  ;;  %1692 = vmatprep.subr.bf16.mxu0 %v1809_v28 }
 0x418   : > { %v1064_v27 = vpop.xlane.xlu0 %1063  ;;  %v847_v29 = vsel %vm730_vm4, %v1781_v26, 0.0 }
 0x419   : > { %v1065_v30 = vsub.f32 %v1057_v12, %v1064_v27  ;;  %848 = vadd.xlane.f32.xlu0 %v847_v29 }
 0x41a   : > { %1693 = vmatpush3.bf16.msra.mxu0 %v1763_v8 }
 0x41b   : > { %v1066_v31 = vmul.f32 1.442695, %v1065_v30  ;;  %1710 = vmatprep.subr.bf16.mxu0 %v1809_v28 }
 0x41d   : > { %1782 = vpow2.f32 %v1066_v31 }
 0x41e   : > { %1784 = vpow2.f32 %v956_v36 }
 0x426   : > { %854 = vrot.lane.b32.xlu1 %v1973_v46, %s1812_s27 }
 0x427   : > { %v1783_v32 = vpop.eup %1782 }
 0x428   : > { %v1068_v33 = vsel %vm730_vm4, %v1783_v32, 0.0  ;;  %v1785_v37 = vpop.eup %1784 }
 0x429   : > { %1069 = vadd.xlane.f32.xlu0 %v1068_v33  ;;  %v958_v38 = vsel %vm730_vm4, %v1785_v37, 0.0 }
 0x43f   : > { %964 = vrot.lane.b32.xlu0 %v1973_v46, %s1815_s30 }
 0x44a   : > { %959 = vadd.xlane.f32.xlu1 %v958_v38 }
 0x45b   : > { %1074 = vrot.lane.b32.xlu1 %v1973_v46, %s1817_s17 }
 0x4a2   : > { %v739_v39 = vpop.xlane.xlu1 %738 }
 0x4a3   : > { %1786 = vrcp.f32 %v739_v39  ;;  %v1764_v39 = vld [vmem:[%s2147_s10] sm:$0xff]  }
 0x4a6   : > { %v849_v40 = vpop.xlane.xlu0 %848  ;;  %v855_v43 = vpop.permute.xlu1 %854 }
 0x4a7   : > { %1788 = vrcp.f32 %v849_v40  ;;  %v860_v47 = vsel %vm746_vm3, %v855_v43, 0  ;;  %v1766_v40 = vld [vmem:[%s2147_s10 + $0x10] sm:$0xff]  }
 0x4ad   : > { %v1787_v41 = vpop.eup %1786 }
 0x4ae   : > { %v741_v42 = vmul.f32 %v1787_v41, %v1779_v23  ;;  %v1767_v41 = vld [vmem:[%s2147_s10 + $0x18] sm:$0xff]  }
 0x4b0   : > { %v742_v44 = vpack.c.bf16 %v741_v42, %v741_v42  ;;  %v1768_v42 = vld [vmem:[%s2149_s12] sm:$0xff]  }
 0x4b1   : > { %v1789_v45 = vpop.eup %1788 }
 0x4b2   : > { %1647 = vmatmul.mubr.msk.bf16.vlgmr.msra.gmra.mrb[8].mxu1 %vm730_vm4, %v742_v44  ;;  %v851_v48 = vmul.f32 %v1789_v45, %v1781_v26 }
 0x4b3   : > { %1657 = vmatpush3.bf16.msra.mxu1 %v860_v47  ;;  %1658 = vmatprep.mubr.msk.bf16.mxu1 %vm1810_vm1, %v1809_v28 }
 0x4b4   : > { %1668 = vmatprep.subr.bf16.mxu1 %v1809_v28  ;;  %v852_v49 = vpack.c.bf16 %v851_v48, %v851_v48  ;;  %v1582_v48 = vld [vmem:[%s2145_s8] ss:$0 sm:$0xff] }
 0x4b6   : > { %v1070_v46 = vpop.xlane.xlu0 %1069 }
 0x4ba   : > { %v965_v50 = vpop.permute.xlu0 %964  ;;  %1659 = vmatmul.mubr.msk.bf16.vlgmr.msra.gmra.mrb[12].mxu1 %vm730_vm4, %v852_v49  ;;  %v1583_v49 = vld [vmem:[%s2146_s9] ss:$0 sm:$0xff] }
 0x4bb   : > { %v970_v51 = vsel %vm746_vm3, %v965_v50, 0  ;;  %1670 = vmatprep.mubr.msk.bf16.mxu1 %vm1810_vm1, %v1809_v28 }
 0x4bc   : > { %1669 = vmatpush3.bf16.msra.mxu1 %v970_v51 }
 0x4bd   : > { %1680 = vmatprep.subr.bf16.mxu1 %v1809_v28 }
 0x4d7   : > { %v960_v52 = vpop.xlane.xlu1 %959 }
 0x4d8   : > { %1790 = vrcp.f32 %v960_v52 }
 0x4d9   : > { %1792 = vrcp.f32 %v1070_v46 }
 0x4db   : > { %v1075_v55 = vpop.permute.xlu1 %1074 }
 0x4dc   : > { %v1080_v58 = vsel %vm746_vm3, %v1075_v55, 0  ;;  %v1771_v55 = vld [vmem:[%s2149_s12 + $0x18] sm:$0xff]  }
 0x4e2   : > { %v1791_v53 = vpop.eup %1790 }
 0x4e3   : > { %v962_v54 = vmul.f32 %v1791_v53, %v1785_v37  ;;  %v1793_v57 = vpop.eup %1792  ;;  %v1769_v53 = vld [vmem:[%s2149_s12 + $0x8] sm:$0xff]  }
 0x4e4   : > { %v1072_v59 = vmul.f32 %v1793_v57, %v1783_v32  ;;  %v1773_v57 = vld [vmem:[%s2149_s12 + $0x28] sm:$0xff]  }
 0x4e5   : > { %v963_v56 = vpack.c.bf16 %v962_v54, %v962_v54  ;;  %v1770_v54 = vld [vmem:[%s2149_s12 + $0x10] sm:$0xff]  }
 0x4e6   : > { %v1073_v60 = vpack.c.bf16 %v1072_v59, %v1072_v59  ;;  %v1775_v59 = vld [vmem:[%s2149_s12 + $0x38] sm:$0xff]  }
 0x4e7   : > { %1671 = vmatmul.mubr.msk.bf16.vlgmr.msra.gmra.mrb[16].mxu1 %vm730_vm4, %v963_v56  ;;  %v1772_v56 = vld [vmem:[%s2149_s12 + $0x20] sm:$0xff]  }
 0x4e8   : > { %1681 = vmatpush3.bf16.msra.mxu1 %v1080_v58  ;;  %1682 = vmatprep.mubr.msk.bf16.mxu1 %vm1810_vm1, %v1809_v28  ;;  %v1774_v58 = vld [vmem:[%s2149_s12 + $0x30] sm:$0xff]  }
 0x4e9   : > { %1698 = vmatprep.subr.bf16.mxu1 %v1809_v28 }
 0x4ef   : > { %1683 = vmatmul.mubr.msk.bf16.vlgmr.msra.gmra.mrb[20].mxu1 %vm730_vm4, %v1073_v60  ;;  %v1584_v60 = vld [vmem:[%s2148_s11] ss:$0 sm:$0xff] }
 0x4f0   : > { %1706 = vmatprep.mubr.msk.bf16.mxu1 %vm1810_vm1, %v1809_v28  ;;  %1699 = vmatpush3.bf16.msra.mxu1 %v1764_v39 }
 0x4f1   : > { %1700 = vmatprep.subr.bf16.mxu1 %v1809_v28 }
 0x585   : > { %v784_v62 = vpop.f32.mrb[8].mxu1 }
 0x586   : > { %v1648_v63 = vpop.f32.mrb[9].mxu1 }
 0x587   : > { %v787_v0 = vpop.f32.mrb[10].mxu1 }
 0x588   : > { %v1649_v1 = vpop.f32.mrb[11].mxu1 }
 0x58d   : > { %v896_v2 = vpop.f32.mrb[12].mxu1 }
 0x58e   : > { %1123 = vrot.lane.b32.xlu1 %v896_v2, %s1816_s0  ;;  %v1660_v3 = vpop.f32.mrb[13].mxu1 }
 0x58f   : > { %v899_v4 = vpop.f32.mrb[14].mxu1 }
 0x590   : > { %v1661_v5 = vpop.f32.mrb[15].mxu1 }
 0x5ba   : > { %v1006_v9 = vpop.f32.mrb[16].mxu1 }
 0x5bb   : > { %1127 = vrot.lane.b32.xlu0 %v1006_v9, %s1814_s29  ;;  %v1672_v10 = vpop.f32.mrb[17].mxu1 }
 0x5bc   : > { %v1009_v11 = vpop.f32.mrb[18].mxu1 }
 0x5bd   : > { %v1673_v12 = vpop.f32.mrb[19].mxu1  ;;  %v1590_v11 = vld [vmem:[%s2150_s13] ss:$0 sm:$0xff] }
 0x5c2   : > { %v1116_v13 = vpop.f32.mrb[20].mxu1 }
 0x5c3   : > { %1131 = vrot.lane.b32.xlu1 %v1116_v13, %s1813_s28  ;;  %v1684_v14 = vpop.f32.mrb[21].mxu1 }
 0x5c4   : > { %v1119_v15 = vpop.f32.mrb[22].mxu1 }
 0x5c5   : > { %v1685_v16 = vpop.f32.mrb[23].mxu1 }
 0x600   : > { %v1124_v17 = vpop.permute.xlu1 %1123 }
 0x601   : > { %v1134_v19 = vsel %vm683_vm2, %v784_v62, %v1124_v17 }
 0x62d   : > { %v1128_v18 = vpop.permute.xlu0 %1127 }
 0x62e   : > { %v1136_v20 = vsel %vm1135_vm5, %v1134_v19, %v1128_v18 }
 0x635   : > { %v1132_v21 = vpop.permute.xlu1 %1131 }
 0x636   : > { %v1138_v22 = vsel %vm1137_vm6, %v1136_v20, %v1132_v21 }
 0x637   : > { %v1139_v23 = vpack.c.bf16 %v1138_v22, %v1138_v22 }
 0x639   : > { %1695 = vmatmul.mubr.msk.bf16.vlgmr.msra.gmra.mrb[12].mxu0 %vm535_vm0, %v1139_v23 }
 0x63a   : > { %1726 = vmatprep.mubr.msk.bf16.mxu0 %vm1810_vm1, %v1809_v28  ;;  %1711 = vmatpush3.bf16.msra.mxu0 %v1768_v42 }
 0x63b   : > { %1712 = vmatprep.subr.bf16.mxu0 %v1809_v28 }
 0x63e   : > { %1713 = vmatpush3.bf16.msra.mxu0 %v1769_v53 }
 0x63f   : > { %1714 = vmatprep.subr.bf16.mxu0 %v1809_v28 }
 0x642   : > { %1715 = vmatpush3.bf16.msra.mxu0 %v1770_v54 }
 0x643   : > { %1716 = vmatprep.subr.bf16.mxu0 %v1809_v28 }
 0x646   : > { %1717 = vmatpush3.bf16.msra.mxu0 %v1771_v55 }
 0x647   : > { %1718 = vmatprep.subr.bf16.mxu0 %v1809_v28 }
 0x64a   : > { %1719 = vmatpush3.bf16.msra.mxu0 %v1772_v56 }
 0x64b   : > { %1720 = vmatprep.subr.bf16.mxu0 %v1809_v28 }
 0x64e   : > { %1721 = vmatpush3.bf16.msra.mxu0 %v1773_v57 }
 0x64f   : > { %1722 = vmatprep.subr.bf16.mxu0 %v1809_v28 }
 0x652   : > { %1723 = vmatpush3.bf16.msra.mxu0 %v1774_v58 }
 0x653   : > { %1724 = vmatprep.subr.bf16.mxu0 %v1809_v28 }
 0x656   : > { %1725 = vmatpush3.bf16.msra.mxu0 %v1775_v59 }
 0x70c   : > { %v1216_v26 = vpop.f32.mrb[12].mxu0 }
 0x70d   : > { %v1217_v27 = vadd.f32 %v1576_v25, %v1216_v26  ;;  %v1696_v29 = vpop.f32.mrb[13].mxu0 }
 0x70e   : > { %v1219_v30 = vpop.f32.mrb[14].mxu0 }
 0x70f   : > { %v1697_v31 = vpop.f32.mrb[15].mxu0  ;;  %v1222_v32 = vadd.f32 %v1217_v27, %v1951_v24  ;;  %v1765_v24 = vld [vmem:[%s2147_s10 + $0x8] sm:$0xff]   ;;  %v1599_v30 = vld [vmem:[%s2151_s14] ss:$0 sm:$0xff] }
 0x710   : > { %1701 = vmatpush3.bf16.msra.mxu1 %v1765_v24 }
 0x711   : > { %v1225_v33 = vsel %vm535_vm0, %v1222_v32, 0.0  ;;  %1702 = vmatprep.subr.bf16.mxu1 %v1809_v28 }
 0x712   : > { %1226 = vadd.xlane.f32.xlu0 %v1225_v33 }
 0x714   : > { %1703 = vmatpush3.bf16.msra.mxu1 %v1766_v40 }
 0x715   : > { %1704 = vmatprep.subr.bf16.mxu1 %v1809_v28 }
 0x718   : > { %1705 = vmatpush3.bf16.msra.mxu1 %v1767_v41 }
 0x79f   : > { %v1227_v34 = vpop.xlane.xlu0 %1226 }
 0x7a0   : > { %v1228_v35 = vmul.f32 0.015625, %v1227_v34 }
 0x7a2   : > { %v1229_v36 = vsub.f32 %v1222_v32, %v1228_v35  ;;  %v1600_v32 = vld [vmem:[%s2152_s15] ss:$0 sm:$0xff] }
 0x7a4   : > { %v1230_v37 = vmul.f32 %v1229_v36, %v1229_v36 }
 0x7a6   : > { %v1231_v38 = vsel %vm535_vm0, %v1230_v37, 0.0 }
 0x7a7   : > { %1232 = vadd.xlane.f32.xlu1 %v1231_v38 }
 0x834   : > { %v1233_v43 = vpop.xlane.xlu1 %1232 }
 0x835   : > { %v1234_v44 = vmul.f32 0.015625, %v1233_v43 }
 0x837   : > { %v1235_v45 = vadd.f32 1e-12, %v1234_v44 }
 0x839   : > { %1794 = vrsqrt.f32 %v1235_v45 }
 0x843   : > { %v1795_v47 = vpop.eup %1794 }
 0x844   : > { %v1237_v46 = vmul.f32 %v1795_v47, %v1229_v36 }
 0x846   : > { %v1244_v50 = vmul.f32 %v1582_v48, %v1237_v46 }
 0x848   : > { %v1251_v51 = vadd.f32 %v1583_v49, %v1244_v50 }
 0x84a   : > { %v1252_v52 = vpack.c.bf16 %v1251_v51, %v1251_v51 }
 0x84c   : > { %1707 = vmatmul.mubr.msk.bf16.vlgmr.msra.gmra.mrb[24].mxu1 %vm535_vm0, %v1252_v52 }
 0x91f   : > { %v1329_v61 = vpop.f32.mrb[24].mxu1 }
 0x920   : > { %v1330_v62 = vadd.f32 %v1584_v60, %v1329_v61  ;;  %v1708_v63 = vpop.f32.mrb[25].mxu1 }
 0x921   : > { %v1332_v0 = vpop.f32.mrb[26].mxu1 }
 0x922   : > { %v1336_v1 = vmul.f32 0.044715, %v1330_v62  ;;  %v1709_v2 = vpop.f32.mrb[27].mxu1  ;;  %v1335_v8 = vmul.f32 0.5, %v1330_v62 }
 0x924   : > { %v1337_v3 = vmul.f32 %v1336_v1, %v1330_v62 }
 0x926   : > { %v1338_v4 = vmul.f32 %v1337_v3, %v1330_v62 }
 0x928   : > { %v1339_v5 = vadd.f32 %v1338_v4, %v1330_v62 }
 0x92a   : > { %v1340_v6 = vmul.f32 0.7978846, %v1339_v5 }
 0x92c   : > { %1796 = vtanh.f32 %v1340_v6 }
 0x936   : > { %v1797_v7 = vpop.eup %1796 }
 0x937   : > { %v1342_v9 = vadd.f32 1.0, %v1797_v7 }
 0x939   : > { %v1343_v28 = vmul.f32 %v1342_v9, %v1335_v8 }
 0x93b   : > { %v1344_v10 = vpack.c.bf16 %v1343_v28, %v1343_v28 }
 0x93d   : > { %1727 = vmatmul.mubr.bf16.vlgmr.msra.gmra.mrb[16].mxu0 %v1344_v10 }
 0xa10   : > { %v1450_v12 = vpop.f32.mrb[16].mxu0 }
 0xa11   : > { %v1451_v13 = vadd.f32 %v1590_v11, %v1450_v12  ;;  %v1728_v14 = vpop.f32.mrb[17].mxu0 }
 0xa12   : > { %v1453_v15 = vpop.f32.mrb[18].mxu0 }
 0xa13   : > { %v1729_v16 = vpop.f32.mrb[19].mxu0  ;;  %v1456_v17 = vadd.f32 %v1451_v13, %v1251_v51 }
 0xa15   : > { %v1459_v18 = vsel %vm535_vm0, %v1456_v17, 0.0 }
 0xa16   : > { %1460 = vadd.xlane.f32.xlu0 %v1459_v18 }
 0xaa3   : > { %v1461_v19 = vpop.xlane.xlu0 %1460 }
 0xaa4   : > { %v1462_v20 = vmul.f32 0.015625, %v1461_v19 }
 0xaa6   : > { %v1463_v21 = vsub.f32 %v1456_v17, %v1462_v20 }
 0xaa8   : > { %v1464_v22 = vmul.f32 %v1463_v21, %v1463_v21 }
 0xaaa   : > { %v1465_v23 = vsel %vm535_vm0, %v1464_v22, 0.0 }
 0xaab   : > { %1466 = vadd.xlane.f32.xlu0 %v1465_v23 }
 0xb38   : > { %v1467_v25 = vpop.xlane.xlu0 %1466 }
 0xb39   : > { %v1468_v26 = vmul.f32 0.015625, %v1467_v25 }
 0xb3b   : > { %v1469_v27 = vadd.f32 1e-12, %v1468_v26 }
 0xb3d   : > { %1798 = vrsqrt.f32 %v1469_v27 }
 0xb47   : > { %v1799_v29 = vpop.eup %1798 }
 0xb48   : > { %v1471_v31 = vmul.f32 %v1799_v29, %v1463_v21 }
 0xb4a   : > { %v1478_v33 = vmul.f32 %v1599_v30, %v1471_v31 }
 0xb4c   : > { %v1485_v34 = vadd.f32 %v1600_v32, %v1478_v33 }
 0xb4e   : > { %1486 = vst.msk [vmem:[%s530_s24] sm:$0xff] %vm535_vm0, %v1485_v34 }
 0xb4f PF: > { %s26_s21 = sadd.s32 1, %s1806_s21  }
 0xb50   : > { %p23_p4 = scmp.ge.s32.totalorder %s26_s21, 4  }
 0xb52   :  { %25 = sbr.rel (!%p23_p4) target bundleno = 2 (0x2), region = 117 }

// kernel: text_encoder_forward.3
= control target key start
LH: loop header
LB: loop body
LE: loop exit
PB: predicated region body
PF: predicated region fallthrough
CT: control target
= control target key end

     0   :  { %s1870_s19 = smov 0   ;;  %s2096_s0 = inlined_call_operand.vmem [shape: f32[16,64], index: 0, kind: input, shape index: {}]   ;;  %s2097_s1 = inlined_call_operand.vmem [shape: f32[2,1,8], index: 1, kind: input, shape index: {}]   ;;  %s2098_s2 = inlined_call_operand.vmem [shape: f32[1,64], index: 2, kind: input, shape index: {}]   ;;  %s2099_s3 = inlined_call_operand.vmem [shape: f32[1,64], index: 3, kind: input, shape index: {}]   ;;  %s2100_s4 = inlined_call_operand.vmem [shape: bf16[64,192], index: 4, kind: input, shape index: {}]   ;;  %s2101_s5 = inlined_call_operand.vmem [shape: f32[1,192], index: 5, kind: input, shape index: {}]   ;;  %s2102_s6 = inlined_call_operand.vmem [shape: bf16[64,64], index: 6, kind: input, shape index: {}]   ;;  %s2103_s7 = inlined_call_operand.vmem [shape: f32[1,64], index: 7, kind: input, shape index: {}]   ;;  %s2104_s8 = inlined_call_operand.vmem [shape: f32[1,64], index: 8, kind: input, shape index: {}]   ;;  %s2105_s9 = inlined_call_operand.vmem [shape: f32[1,64], index: 9, kind: input, shape index: {}]   ;;  %s2106_s10 = inlined_call_operand.vmem [shape: bf16[64,128], index: 10, kind: input, shape index: {}]   ;;  %s2107_s11 = inlined_call_operand.vmem [shape: f32[1,128], index: 11, kind: input, shape index: {}]   ;;  %s2108_s12 = inlined_call_operand.vmem [shape: bf16[128,64], index: 12, kind: input, shape index: {}]   ;;  %s2109_s13 = inlined_call_operand.vmem [shape: f32[1,64], index: 13, kind: input, shape index: {}]   ;;  %s2110_s14 = inlined_call_operand.vmem [shape: f32[1,64], index: 14, kind: input, shape index: {}]   ;;  %s2111_s15 = inlined_call_operand.vmem [shape: f32[1,64], index: 15, kind: input, shape index: {}]   ;;  %s2112_s16 = inlined_call_operand.vmem [shape: f32[16,64], index: 16, kind: output, shape index: {}]  }
   0x1   :  { %2113 = sst [smem:[#allocation2_spill]] %s2096_s0 }
   0x2 LB: > { %s1520_s20 = sadd.s32 4294967295, %s1773_s19   ;;  %p1524_p0 = scmp.ge.s32.totalorder %s1773_s19, 1  ;;  %s1773_s19 = sphi %s1870_s19, %s26_s19  }
   0x3   : > { %p469_p1 = scmp.lt.s32.totalorder %s1773_s19, 3 }
   0x5   : > { %p470_p2 = pnand %p1524_p0, %p469_p1 }
   0x6   : > { %v1717_v0 = vld [vmem:[%s2100_s4 + $0x4] ss:$8 sps:$4 sm:$0xff] (!%p470_p2)   ;;  %p520_p3 = scmp.lt.s32.totalorder (!%p470_p2), %s1520_s20, 1  ;;  %v1719_v1 = vld [vmem:[%s2100_s4] ss:$8 sps:$4 sm:$0xff] (!%p470_p2)   ;;  %v1775_v2 = vmov (!%p470_p2), 0   ;;  %v544_v11 = vlaneseq (!%p470_p2) }
   0x7   : > { %473 = sbr.rel (%p470_p2) target bundleno = 2581 (0xa15), region = 84  ;;  %630 = vmatprep.mubr.bf16.mxu1 (!%p470_p2), %v1775_v2  ;;  %598 = vmatprep.subr.bf16.mxu1 (!%p470_p2), %v1717_v0  ;;  %v1720_v3 = vld [vmem:[%s2100_s4 + $0x14] ss:$8 sps:$4 sm:$0xff] (!%p470_p2)   ;;  %v1722_v4 = vld [vmem:[%s2100_s4 + $0x10] ss:$8 sps:$4 sm:$0xff] (!%p470_p2)   ;;  %s2114_s3 = sld [smem:[#allocation2_spill]] (!%p470_p2) }
   0x8   : > { %599 = vmatpush1.bf16.msra.mxu1 (!%p470_p2), %v1719_v1  ;;  %v1723_v5 = vld [vmem:[%s2100_s4 + $0x24] ss:$8 sps:$4 sm:$0xff] (!%p470_p2)   ;;  %v1725_v6 = vld [vmem:[%s2100_s4 + $0x20] ss:$8 sps:$4 sm:$0xff] (!%p470_p2)   ;;  %v1726_v7 = vld [vmem:[%s2100_s4 + $0x34] ss:$8 sps:$4 sm:$0xff] (!%p470_p2)  }
   0x9   : > { %600 = vmatprep.subr.bf16.mxu1 (!%p470_p2), %v1720_v3  ;;  %vm594_vm0 = vcmask (!%p470_p2), 523264   ;;  %v1728_v8 = vld [vmem:[%s2100_s4 + $0x30] ss:$8 sps:$4 sm:$0xff] (!%p470_p2)   ;;  %v545_v12 = vshrl.u32 (!%p470_p2), %v544_v11, 7  ;;  %v1776_v13 = vmov (!%p470_p2), 0.0   ;;  %vm1777_vm1 = vmmov (!%p470_p2), 0  }
   0xa   : > { %1619 = vmatprep.subr.bf16.mxu0 (!%p470_p2), %v1776_v13  ;;  %v542_v15 = vld [vmem:[%s2101_s5] sm:$0x3] (!%p470_p2)  ;;  %1621 = vmatprep.mubr.msk.bf16.mxu0 (!%p470_p2), %vm1777_vm1, %v1776_v13  ;;  %s1778_s27 = smov (!%p470_p2), 64   ;;  %s1779_s28 = smov (!%p470_p2), 112   ;;  %vm653_vm2 = vcmask (!%p470_p2), 130048   ;;  %vm716_vm3 = vcmask (!%p470_p2), 1043456  }
   0xb   : > { %v546_v14 = vsub.s32 (!%p470_p2), 0, %v545_v12  ;;  %s1780_s29 = smov (!%p470_p2), 48   ;;  %s1781_s30 = smov (!%p470_p2), 32   ;;  %v550_v25 = vsub.s32 (!%p470_p2), 1, %v545_v12  ;;  %vm700_vm4 = vcmask (!%p470_p2), 64512   ;;  %vm1105_vm5 = vcmask (!%p470_p2), 261120  }
   0xc   : > { %601 = vmatpush1.bf16.msra.mxu1 (!%p470_p2), %v1722_v4  ;;  %s1782_s17 = smov (!%p470_p2), 96   ;;  %s1783_s18 = smov (!%p470_p2), 16   ;;  %vm1107_vm6 = vcmask (!%p470_p2), 392192  }
   0xd   : > { %602 = vmatprep.subr.bf16.mxu1 (!%p470_p2), %v1723_v5  ;;  %v547_v16 = vrot.slane (!%p470_p2), %v542_v15, %v546_v14  ;;  %s1784_s2 = smov (!%p470_p2), 80   ;;  %v551_v26 = vrot.slane (!%p470_p2), %v542_v15, %v550_v25 }
   0xe   : > { %s2116_s20 = smov (!%p520_p3, %s1520_s20), 1 }
   0xf   : > { %s1525_s0 = sshll.u32 %s2116_s20, 3 }
  0x10   : > { %s523_s22 = scalar_lea.vmem %s2114_s3, %s1525_s0  ;;  %603 = vmatpush1.bf16.msra.mxu1 %v1725_v6 }
  0x11   : > { %v1910_v9 = vld [vmem:[%s523_s22] sm:$0xff]  ;;  %604 = vmatprep.subr.bf16.mxu1 %v1726_v7  ;;  %s526_s22 = scalar_lea.vmem %s2097_s1, %s2116_s20 }
  0x12   : > { %v533_v10 = vpack.c.bf16 %v1910_v9, %v1910_v9  ;;  %v1536_v41 = vld [vmem:[%s526_s22] ss:$0 sm:$0xff] }
  0x14   : > { %605 = vmatpush1.bf16.msra.mxu1 %v1728_v8 }
  0x15   : > { %1607 = vmatprep.subr.bf16.mxu1 %v1776_v13 }
  0x17   : > { %1535 = vmatmul.mubr.msk.bf16.vlgmr.msra.gmra.mrb[0].mxu1 %vm594_vm0, %v533_v10 }
  0x18   : > { %1609 = vmatprep.mubr.msk.bf16.mxu1 %vm1777_vm1, %v1776_v13 }
  0xea   : > { %v632_v17 = vpop.f32.mrb[0].mxu1 }
  0xeb   : > { %v633_v18 = vadd.f32 %v632_v17, %v547_v16  ;;  %v634_v19 = vpop.f32.mrb[1].mxu1 }
  0xec   : > { %v636_v20 = vpop.f32.mrb[2].mxu1  ;;  %v635_v28 = vadd.f32 %v634_v19, %v551_v26 }
  0xed   : > { %v640_v21 = vmul.f32 0.25, %v633_v18  ;;  %v642_v22 = vpack.c.bf16 %v633_v18, %v633_v18  ;;  %v637_v23 = vpop.f32.mrb[3].mxu1 }
  0xee   : > { %v1932_v32 = vpack.c.bf16 %v635_v28, %v635_v28 }
  0xef   : > { %v641_v24 = vpack.c.bf16 %v640_v21, %v640_v21  ;;  %651 = vrot.lane.b32.xlu0 %v642_v22, %s1778_s27 }
  0xf0   : > { %v718_v34 = vsel %vm716_vm3, %v1932_v32, 0 }
  0xf1   : > { %761 = vrot.lane.b32.xlu1 %v641_v24, %s1779_s28 }
  0xf3   : > { %763 = vrot.lane.b32.xlu0 %v642_v22, %s1780_s29 }
  0xf5   : > { %874 = vrot.lane.b32.xlu1 %v642_v22, %s1781_s30 }
  0xf7   : > { %872 = vrot.lane.b32.xlu0 %v641_v24, %s1782_s17 }
  0xf9   : > { %984 = vrot.lane.b32.xlu1 %v642_v22, %s1783_s18 }
  0xfb   : > { %982 = vrot.lane.b32.xlu0 %v641_v24, %s1784_s2 }
 0x161   : > { %v652_v27 = vpop.permute.xlu0 %651 }
 0x162   : > { %v658_v29 = vsel %vm653_vm2, %v652_v27, 0 }
 0x163   : > { %1608 = vmatpush3.bf16.xpose.msra.mxu1 %v658_v29  ;;  %v762_v30 = vpop.permute.xlu1 %761 }
 0x164   : > { %1613 = vmatprep.subr.bf16.mxu1 %v1776_v13 }
 0x165   : > { %v764_v31 = vpop.permute.xlu0 %763 }
 0x166   : > { %v769_v33 = vsel %vm653_vm2, %v764_v31, 0 }
 0x167   : > { %1620 = vmatpush3.bf16.xpose.msra.mxu0 %v769_v33  ;;  %v875_v35 = vpop.permute.xlu1 %874 }
 0x168   : > { %1631 = vmatprep.subr.bf16.mxu0 %v1776_v13  ;;  %v880_v36 = vsel %vm653_vm2, %v875_v35, 0 }
 0x169   : > { %v873_v38 = vpop.permute.xlu0 %872 }
 0x16a   : > { %1610 = vmatmul.mubr.msk.bf16.vlgmr.msra.gmra.mrb[4].mxu1 %vm653_vm2, %v641_v24 }
 0x16b   : > { %1614 = vmatpush3.bf16.msra.mxu1 %v718_v34  ;;  %1615 = vmatprep.mubr.msk.bf16.mxu1 %vm1777_vm1, %v1776_v13  ;;  %v985_v37 = vpop.permute.xlu1 %984 }
 0x16c   : > { %1625 = vmatprep.subr.bf16.mxu1 %v1776_v13  ;;  %v990_v39 = vsel %vm653_vm2, %v985_v37, 0 }
 0x16d   : > { %v983_v40 = vpop.permute.xlu0 %982 }
 0x16e   : > { %1622 = vmatmul.mubr.msk.bf16.vlgmr.msra.gmra.mrb[0].mxu0 %vm653_vm2, %v762_v30 }
 0x16f   : > { %1632 = vmatpush3.bf16.xpose.msra.mxu0 %v880_v36  ;;  %1633 = vmatprep.mubr.msk.bf16.mxu0 %vm1777_vm1, %v1776_v13 }
 0x170   : > { %1643 = vmatprep.subr.bf16.mxu0 %v1776_v13 }
 0x176   : > { %1634 = vmatmul.mubr.msk.bf16.vlgmr.msra.gmra.mrb[4].mxu0 %vm653_vm2, %v873_v38 }
 0x177   : > { %1644 = vmatpush3.bf16.xpose.msra.mxu0 %v990_v39  ;;  %1645 = vmatprep.mubr.msk.bf16.mxu0 %vm1777_vm1, %v1776_v13 }
 0x178   : > { %1655 = vmatprep.subr.bf16.mxu0 %v1776_v13 }
 0x17e   : > { %1646 = vmatmul.mubr.msk.bf16.vlgmr.msra.gmra.mrb[8].mxu0 %vm653_vm2, %v983_v40 }
 0x17f   : > { %1663 = vmatprep.mubr.msk.bf16.mxu0 %vm1777_vm1, %v1776_v13 }
 0x23d   : > { %v694_v42 = vpop.f32.mrb[4].mxu1 }
 0x23e   : > { %v695_v43 = vadd.f32 %v1536_v41, %v694_v42  ;;  %v1611_v44 = vpop.f32.mrb[5].mxu1 }
 0x23f   : > { %v697_v45 = vpop.f32.mrb[6].mxu1 }
 0x240   : > { %v1612_v46 = vpop.f32.mrb[7].mxu1  ;;  %v701_v47 = vsel %vm700_vm4, %v695_v43, -inf }
 0x241   : > { %v805_v48 = vpop.f32.mrb[0].mxu0  ;;  %702 = vmax.xlane.f32.xlu1 %v701_v47 }
 0x242   : > { %v806_v49 = vadd.f32 %v1536_v41, %v805_v48  ;;  %v1623_v50 = vpop.f32.mrb[1].mxu0 }
 0x243   : > { %v808_v51 = vpop.f32.mrb[2].mxu0  ;;  %v1729_v50 = vld [vmem:[%s2102_s6] sm:$0xff]  }
 0x244   : > { %v1624_v52 = vpop.f32.mrb[3].mxu0  ;;  %v811_v53 = vsel %vm700_vm4, %v806_v49, -inf  ;;  %1656 = vmatpush3.bf16.msra.mxu0 %v1729_v50  ;;  %v1730_v51 = vld [vmem:[%s2102_s6 + $0x8] sm:$0xff]  }
 0x245   : > { %812 = vmax.xlane.f32.xlu0 %v811_v53  ;;  %1657 = vmatprep.subr.bf16.mxu0 %v1776_v13 }
 0x248   : > { %1658 = vmatpush3.bf16.msra.mxu0 %v1730_v51 }
 0x249   : > { %v916_v54 = vpop.f32.mrb[4].mxu0  ;;  %1659 = vmatprep.subr.bf16.mxu0 %v1776_v13 }
 0x24a   : > { %v917_v55 = vadd.f32 %v1536_v41, %v916_v54  ;;  %v1635_v56 = vpop.f32.mrb[5].mxu0 }
 0x24b   : > { %v919_v57 = vpop.f32.mrb[6].mxu0 }
 0x24c   : > { %v1636_v58 = vpop.f32.mrb[7].mxu0  ;;  %v922_v59 = vsel %vm700_vm4, %v917_v55, -inf }
 0x24d   : > { %923 = vmax.xlane.f32.xlu0 %v922_v59 }
 0x251   : > { %v1026_v60 = vpop.f32.mrb[8].mxu0 }
 0x252   : > { %v1027_v61 = vadd.f32 %v1536_v41, %v1026_v60  ;;  %v1647_v62 = vpop.f32.mrb[9].mxu0 }
 0x253   : > { %v1029_v63 = vpop.f32.mrb[10].mxu0 }
 0x254   : > { %v1648_v0 = vpop.f32.mrb[11].mxu0  ;;  %v1032_v1 = vsel %vm700_vm4, %v1027_v61, -inf }
 0x255   : > { %1033 = vmax.xlane.f32.xlu1 %v1032_v1 }
 0x2ce   : > { %v703_v2 = vpop.xlane.xlu1 %702 }
 0x2cf   : > { %v704_v3 = vsub.f32 %v695_v43, %v703_v2 }
 0x2d1   : > { %v705_v4 = vmul.f32 1.442695, %v704_v3 }
 0x2d2   : > { %v813_v5 = vpop.xlane.xlu0 %812 }
 0x2d3   : > { %1745 = vpow2.f32 %v705_v4  ;;  %v814_v6 = vsub.f32 %v806_v49, %v813_v5 }
 0x2d5   : > { %v815_v7 = vmul.f32 1.442695, %v814_v6 }
 0x2d7   : > { %1747 = vpow2.f32 %v815_v7 }
 0x2da   : > { %v924_v8 = vpop.xlane.xlu0 %923 }
 0x2db   : > { %v925_v10 = vsub.f32 %v917_v55, %v924_v8  ;;  %v1731_v55 = vld [vmem:[%s2102_s6 + $0x10] sm:$0xff]  }
 0x2dc   : > { %1660 = vmatpush3.bf16.msra.mxu0 %v1731_v55 }
 0x2dd   : > { %v1746_v11 = vpop.eup %1745  ;;  %v926_v12 = vmul.f32 1.442695, %v925_v10  ;;  %1661 = vmatprep.subr.bf16.mxu0 %v1776_v13  ;;  %v1545_v10 = vld [vmem:[%s2103_s7] ss:$0 sm:$0xff] }
 0x2de   : > { %v707_v14 = vsel %vm700_vm4, %v1746_v11, 0.0 }
 0x2df   : > { %1749 = vpow2.f32 %v926_v12  ;;  %708 = vadd.xlane.f32.xlu0 %v707_v14 }
 0x2e1   : > { %v1748_v15 = vpop.eup %1747 }
 0x2e2   : > { %v817_v16 = vsel %vm700_vm4, %v1748_v15, 0.0  ;;  %v1034_v19 = vpop.xlane.xlu1 %1033 }
 0x2e3   : > { %818 = vadd.xlane.f32.xlu1 %v817_v16  ;;  %v1035_v20 = vsub.f32 %v1027_v61, %v1034_v19  ;;  %v1732_v61 = vld [vmem:[%s2102_s6 + $0x18] sm:$0xff]  }
 0x2e4   : > { %1662 = vmatpush3.bf16.msra.mxu0 %v1732_v61 }
 0x2e5   : > { %v1036_v21 = vmul.f32 1.442695, %v1035_v20  ;;  %1679 = vmatprep.subr.bf16.mxu0 %v1776_v13 }
 0x2e7   : > { %1751 = vpow2.f32 %v1036_v21 }
 0x2e9   : > { %v1750_v17 = vpop.eup %1749 }
 0x2ea   : > { %v928_v18 = vsel %vm700_vm4, %v1750_v17, 0.0 }
 0x2eb   : > { %929 = vadd.xlane.f32.xlu0 %v928_v18 }
 0x2f1   : > { %v1752_v22 = vpop.eup %1751 }
 0x2f2   : > { %v1038_v23 = vsel %vm700_vm4, %v1752_v22, 0.0 }
 0x2f4   : > { %934 = vrot.lane.b32.xlu1 %v1932_v32, %s1782_s17  ;;  %s530_s17 = scalar_lea.vmem %s2112_s16, %s1525_s0 }
 0x301   : > { %824 = vrot.lane.b32.xlu0 %v1932_v32, %s1779_s28 }
 0x318   : > { %1039 = vadd.xlane.f32.xlu1 %v1038_v23 }
 0x329   : > { %1044 = vrot.lane.b32.xlu1 %v1932_v32, %s1784_s2 }
 0x36c   : > { %v709_v24 = vpop.xlane.xlu0 %708 }
 0x36d   : > { %1753 = vrcp.f32 %v709_v24  ;;  %v1733_v24 = vld [vmem:[%s2106_s10] sm:$0xff]  }
 0x370   : > { %v819_v25 = vpop.xlane.xlu1 %818 }
 0x371   : > { %1755 = vrcp.f32 %v819_v25  ;;  %v1735_v25 = vld [vmem:[%s2106_s10 + $0x10] sm:$0xff]  }
 0x374   : > { %v935_v32 = vpop.permute.xlu1 %934 }
 0x375   : > { %v940_v37 = vsel %vm716_vm3, %v935_v32, 0  ;;  %v1552_v32 = vld [vmem:[%s2105_s9] ss:$0 sm:$0xff] }
 0x377   : > { %v1754_v26 = vpop.eup %1753 }
 0x378   : > { %v711_v27 = vmul.f32 %v1754_v26, %v1746_v11  ;;  %v930_v28 = vpop.xlane.xlu0 %929  ;;  %v1736_v26 = vld [vmem:[%s2106_s10 + $0x18] sm:$0xff]  }
 0x379   : > { %1757 = vrcp.f32 %v930_v28 }
 0x37a   : > { %v712_v29 = vpack.c.bf16 %v711_v27, %v711_v27  ;;  %v1737_v27 = vld [vmem:[%s2108_s12] sm:$0xff]  }
 0x37b   : > { %v1756_v30 = vpop.eup %1755 }
 0x37c   : > { %1616 = vmatmul.mubr.msk.bf16.vlgmr.msra.gmra.mrb[8].mxu1 %vm700_vm4, %v712_v29  ;;  %v825_v31 = vpop.permute.xlu0 %824  ;;  %v821_v34 = vmul.f32 %v1756_v30, %v1748_v15 }
 0x37d   : > { %v830_v33 = vsel %vm716_vm3, %v825_v31, 0  ;;  %1627 = vmatprep.mubr.msk.bf16.mxu1 %vm1777_vm1, %v1776_v13 }
 0x37e   : > { %1626 = vmatpush3.bf16.msra.mxu1 %v830_v33  ;;  %v822_v35 = vpack.c.bf16 %v821_v34, %v821_v34  ;;  %v1551_v33 = vld [vmem:[%s2104_s8] ss:$0 sm:$0xff] }
 0x37f   : > { %1637 = vmatprep.subr.bf16.mxu1 %v1776_v13 }
 0x383   : > { %v1758_v36 = vpop.eup %1757 }
 0x384   : > { %1628 = vmatmul.mubr.msk.bf16.vlgmr.msra.gmra.mrb[12].mxu1 %vm700_vm4, %v822_v35  ;;  %v932_v38 = vmul.f32 %v1758_v36, %v1750_v17 }
 0x385   : > { %1638 = vmatpush3.bf16.msra.mxu1 %v940_v37  ;;  %1639 = vmatprep.mubr.msk.bf16.mxu1 %vm1777_vm1, %v1776_v13 }
 0x386   : > { %1649 = vmatprep.subr.bf16.mxu1 %v1776_v13  ;;  %v933_v39 = vpack.c.bf16 %v932_v38, %v932_v38  ;;  %v1738_v38 = vld [vmem:[%s2108_s12 + $0x8] sm:$0xff]  }
 0x38c   : > { %1640 = vmatmul.mubr.msk.bf16.vlgmr.msra.gmra.mrb[16].mxu1 %vm700_vm4, %v933_v39  ;;  %v1739_v39 = vld [vmem:[%s2108_s12 + $0x10] sm:$0xff]  }
 0x38d   : > { %1651 = vmatprep.mubr.msk.bf16.mxu1 %vm1777_vm1, %v1776_v13 }
 0x3a5   : > { %v1040_v40 = vpop.xlane.xlu1 %1039 }
 0x3a6   : > { %1759 = vrcp.f32 %v1040_v40  ;;  %v1740_v40 = vld [vmem:[%s2108_s12 + $0x18] sm:$0xff]  }
 0x3a9   : > { %v1045_v41 = vpop.permute.xlu1 %1044 }
 0x3aa   : > { %v1050_v42 = vsel %vm716_vm3, %v1045_v41, 0  ;;  %v1741_v41 = vld [vmem:[%s2108_s12 + $0x20] sm:$0xff]  }
 0x3ab   : > { %1650 = vmatpush3.bf16.msra.mxu1 %v1050_v42  ;;  %v1742_v42 = vld [vmem:[%s2108_s12 + $0x28] sm:$0xff]  }
 0x3ac   : > { %1667 = vmatprep.subr.bf16.mxu1 %v1776_v13 }
 0x3b0   : > { %v1760_v43 = vpop.eup %1759 }
 0x3b1   : > { %v1042_v44 = vmul.f32 %v1760_v43, %v1752_v22  ;;  %v1743_v43 = vld [vmem:[%s2108_s12 + $0x30] sm:$0xff]  }
 0x3b3   : > { %v1043_v45 = vpack.c.bf16 %v1042_v44, %v1042_v44  ;;  %v1744_v44 = vld [vmem:[%s2108_s12 + $0x38] sm:$0xff]  }
 0x3b5   : > { %1652 = vmatmul.mubr.msk.bf16.vlgmr.msra.gmra.mrb[20].mxu1 %vm700_vm4, %v1043_v45  ;;  %v1553_v45 = vld [vmem:[%s2107_s11] ss:$0 sm:$0xff] }
 0x3b6   : > { %1675 = vmatprep.mubr.msk.bf16.mxu1 %vm1777_vm1, %v1776_v13  ;;  %1668 = vmatpush3.bf16.msra.mxu1 %v1733_v24 }
 0x3b7   : > { %1669 = vmatprep.subr.bf16.mxu1 %v1776_v13 }
 0x44f   : > { %v754_v46 = vpop.f32.mrb[8].mxu1 }
 0x450   : > { %v1617_v47 = vpop.f32.mrb[9].mxu1 }
 0x451   : > { %v757_v48 = vpop.f32.mrb[10].mxu1 }
 0x452   : > { %v1618_v49 = vpop.f32.mrb[11].mxu1 }
 0x457   : > { %v866_v52 = vpop.f32.mrb[12].mxu1 }
 0x458   : > { %1093 = vrot.lane.b32.xlu0 %v866_v52, %s1783_s18  ;;  %v1629_v53 = vpop.f32.mrb[13].mxu1 }
 0x459   : > { %v869_v54 = vpop.f32.mrb[14].mxu1 }
 0x45a   : > { %v1630_v56 = vpop.f32.mrb[15].mxu1 }
 0x45f   : > { %v976_v57 = vpop.f32.mrb[16].mxu1 }
 0x460   : > { %1097 = vrot.lane.b32.xlu1 %v976_v57, %s1781_s30  ;;  %v1641_v58 = vpop.f32.mrb[17].mxu1 }
 0x461   : > { %v979_v59 = vpop.f32.mrb[18].mxu1 }
 0x462   : > { %v1642_v60 = vpop.f32.mrb[19].mxu1 }
 0x463   : > { %v1559_v60 = vld [vmem:[%s2109_s13] ss:$0 sm:$0xff] }
 0x488   : > { %v1086_v62 = vpop.f32.mrb[20].mxu1 }
 0x489   : > { %1101 = vrot.lane.b32.xlu0 %v1086_v62, %s1780_s29  ;;  %v1653_v63 = vpop.f32.mrb[21].mxu1 }
 0x48a   : > { %v1089_v0 = vpop.f32.mrb[22].mxu1 }
 0x48b   : > { %v1654_v1 = vpop.f32.mrb[23].mxu1 }
 0x4ca   : > { %v1094_v2 = vpop.permute.xlu0 %1093 }
 0x4cb   : > { %v1104_v4 = vsel %vm653_vm2, %v754_v46, %v1094_v2 }
 0x4d2   : > { %v1098_v3 = vpop.permute.xlu1 %1097 }
 0x4d3   : > { %v1106_v5 = vsel %vm1105_vm5, %v1104_v4, %v1098_v3 }
 0x4fb   : > { %v1102_v6 = vpop.permute.xlu0 %1101 }
 0x4fc   : > { %v1108_v7 = vsel %vm1107_vm6, %v1106_v5, %v1102_v6 }
 0x4fd   : > { %v1109_v8 = vpack.c.bf16 %v1108_v7, %v1108_v7 }
 0x4ff   : > { %1664 = vmatmul.mubr.msk.bf16.vlgmr.msra.gmra.mrb[12].mxu0 %vm594_vm0, %v1109_v8 }
 0x500   : > { %1695 = vmatprep.mubr.msk.bf16.mxu0 %vm1777_vm1, %v1776_v13  ;;  %1680 = vmatpush3.bf16.msra.mxu0 %v1737_v27 }
 0x501   : > { %1681 = vmatprep.subr.bf16.mxu0 %v1776_v13 }
 0x504   : > { %1682 = vmatpush3.bf16.msra.mxu0 %v1738_v38 }
 0x505   : > { %1683 = vmatprep.subr.bf16.mxu0 %v1776_v13 }
 0x508   : > { %1684 = vmatpush3.bf16.msra.mxu0 %v1739_v39 }
 0x509   : > { %1685 = vmatprep.subr.bf16.mxu0 %v1776_v13 }
 0x50c   : > { %1686 = vmatpush3.bf16.msra.mxu0 %v1740_v40 }
 0x50d   : > { %1687 = vmatprep.subr.bf16.mxu0 %v1776_v13 }
 0x510   : > { %1688 = vmatpush3.bf16.msra.mxu0 %v1741_v41 }
 0x511   : > { %1689 = vmatprep.subr.bf16.mxu0 %v1776_v13 }
 0x514   : > { %1690 = vmatpush3.bf16.msra.mxu0 %v1742_v42 }
 0x515   : > { %1691 = vmatprep.subr.bf16.mxu0 %v1776_v13 }
 0x518   : > { %1692 = vmatpush3.bf16.msra.mxu0 %v1743_v43 }
 0x519   : > { %1693 = vmatprep.subr.bf16.mxu0 %v1776_v13 }
 0x51c   : > { %1694 = vmatpush3.bf16.msra.mxu0 %v1744_v44 }
 0x5d2   : > { %v1186_v11 = vpop.f32.mrb[12].mxu0 }
 0x5d3   : > { %v1187_v12 = vadd.f32 %v1545_v10, %v1186_v11  ;;  %v1665_v14 = vpop.f32.mrb[13].mxu0 }
 0x5d4   : > { %v1189_v15 = vpop.f32.mrb[14].mxu0 }
 0x5d5   : > { %v1666_v16 = vpop.f32.mrb[15].mxu0  ;;  %v1192_v17 = vadd.f32 %v1187_v12, %v1910_v9  ;;  %v1734_v9 = vld [vmem:[%s2106_s10 + $0x8] sm:$0xff]   ;;  %v1568_v15 = vld [vmem:[%s2110_s14] ss:$0 sm:$0xff] }
 0x5d6   : > { %1670 = vmatpush3.bf16.msra.mxu1 %v1734_v9 }
 0x5d7   : > { %v1195_v18 = vsel %vm594_vm0, %v1192_v17, 0.0  ;;  %1671 = vmatprep.subr.bf16.mxu1 %v1776_v13 }
 0x5d8   : > { %1196 = vadd.xlane.f32.xlu1 %v1195_v18 }
 0x5da   : > { %1672 = vmatpush3.bf16.msra.mxu1 %v1735_v25 }
 0x5db   : > { %1673 = vmatprep.subr.bf16.mxu1 %v1776_v13 }
 0x5de   : > { %1674 = vmatpush3.bf16.msra.mxu1 %v1736_v26 }
 0x665   : > { %v1197_v19 = vpop.xlane.xlu1 %1196 }
 0x666   : > { %v1199_v20 = vmul.f32 0.015625, %v1197_v19 }
 0x668   : > { %v1200_v21 = vsub.f32 %v1192_v17, %v1199_v20  ;;  %v1569_v17 = vld [vmem:[%s2111_s15] ss:$0 sm:$0xff] }
 0x66a   : > { %v1201_v22 = vmul.f32 %v1200_v21, %v1200_v21 }
 0x66c   : > { %v1202_v23 = vsel %vm594_vm0, %v1201_v22, 0.0 }
 0x66d   : > { %1203 = vadd.xlane.f32.xlu0 %v1202_v23 }
 0x6fa   : > { %v1204_v28 = vpop.xlane.xlu0 %1203 }
 0x6fb   : > { %v1205_v29 = vmul.f32 0.015625, %v1204_v28 }
 0x6fd   : > { %v1206_v30 = vadd.f32 1e-12, %v1205_v29 }
 0x6ff   : > { %1761 = vrsqrt.f32 %v1206_v30 }
 0x709   : > { %v1762_v31 = vpop.eup %1761 }
 0x70a   : > { %v1208_v34 = vmul.f32 %v1762_v31, %v1200_v21 }
 0x70c   : > { %v1215_v35 = vmul.f32 %v1551_v33, %v1208_v34 }
 0x70e   : > { %v1222_v36 = vadd.f32 %v1552_v32, %v1215_v35 }
 0x710   : > { %v1223_v37 = vpack.c.bf16 %v1222_v36, %v1222_v36 }
 0x712   : > { %1676 = vmatmul.mubr.msk.bf16.vlgmr.msra.gmra.mrb[24].mxu1 %vm594_vm0, %v1223_v37 }
 0x7e5   : > { %v1300_v46 = vpop.f32.mrb[24].mxu1 }
 0x7e6   : > { %v1301_v47 = vadd.f32 %v1553_v45, %v1300_v46  ;;  %v1677_v48 = vpop.f32.mrb[25].mxu1 }
 0x7e7   : > { %v1303_v49 = vpop.f32.mrb[26].mxu1 }
 0x7e8   : > { %v1307_v50 = vmul.f32 0.044715, %v1301_v47  ;;  %v1678_v51 = vpop.f32.mrb[27].mxu1  ;;  %v1306_v57 = vmul.f32 0.5, %v1301_v47 }
 0x7ea   : > { %v1308_v52 = vmul.f32 %v1307_v50, %v1301_v47 }
 0x7ec   : > { %v1309_v53 = vmul.f32 %v1308_v52, %v1301_v47 }
 0x7ee   : > { %v1310_v54 = vadd.f32 %v1309_v53, %v1301_v47 }
 0x7f0   : > { %v1311_v55 = vmul.f32 0.7978846, %v1310_v54 }
 0x7f2   : > { %1763 = vtanh.f32 %v1311_v55 }
 0x7fc   : > { %v1764_v56 = vpop.eup %1763 }
 0x7fd   : > { %v1313_v58 = vadd.f32 1.0, %v1764_v56 }
 0x7ff   : > { %v1314_v13 = vmul.f32 %v1313_v58, %v1306_v57 }
 0x801   : > { %v1315_v59 = vpack.c.bf16 %v1314_v13, %v1314_v13 }
 0x803   : > { %1696 = vmatmul.mubr.bf16.vlgmr.msra.gmra.mrb[16].mxu0 %v1315_v59 }
 0x8d6   : > { %v1421_v61 = vpop.f32.mrb[16].mxu0 }
 0x8d7   : > { %v1422_v62 = vadd.f32 %v1559_v60, %v1421_v61  ;;  %v1697_v63 = vpop.f32.mrb[17].mxu0 }
 0x8d8   : > { %v1424_v0 = vpop.f32.mrb[18].mxu0 }
 0x8d9   : > { %v1698_v1 = vpop.f32.mrb[19].mxu0  ;;  %v1427_v2 = vadd.f32 %v1422_v62, %v1222_v36 }
 0x8db   : > { %v1430_v3 = vsel %vm594_vm0, %v1427_v2, 0.0 }
 0x8dc   : > { %1431 = vadd.xlane.f32.xlu0 %v1430_v3 }
 0x969   : > { %v1432_v4 = vpop.xlane.xlu0 %1431 }
 0x96a   : > { %v1433_v5 = vmul.f32 0.015625, %v1432_v4 }
 0x96c   : > { %v1434_v6 = vsub.f32 %v1427_v2, %v1433_v5 }
 0x96e   : > { %v1435_v7 = vmul.f32 %v1434_v6, %v1434_v6 }
 0x970   : > { %v1436_v8 = vsel %vm594_vm0, %v1435_v7, 0.0 }
 0x971   : > { %1437 = vadd.xlane.f32.xlu1 %v1436_v8 }
 0x9fe   : > { %v1438_v10 = vpop.xlane.xlu1 %1437 }
 0x9ff   : > { %v1439_v11 = vmul.f32 0.015625, %v1438_v10 }
 0xa01   : > { %v1440_v12 = vadd.f32 1e-12, %v1439_v11 }
 0xa03   : > { %1765 = vrsqrt.f32 %v1440_v12 }
 0xa0d   : > { %v1766_v14 = vpop.eup %1765 }
 0xa0e   : > { %v1442_v16 = vmul.f32 %v1766_v14, %v1434_v6 }
 0xa10   : > { %v1449_v18 = vmul.f32 %v1568_v15, %v1442_v16 }
 0xa12   : > { %v1456_v19 = vadd.f32 %v1569_v17, %v1449_v18 }
 0xa14   : > { %1457 = vst.msk [vmem:[%s530_s17] sm:$0xff] %vm594_vm0, %v1456_v19 }
 0xa15 PF: > { %s26_s19 = sadd.s32 1, %s1773_s19  }
 0xa16   : > { %p23_p4 = scmp.ge.s32.totalorder %s26_s19, 4  }
 0xa18   :  { %25 = sbr.rel (!%p23_p4) target bundleno = 2 (0x2), region = 117 }

</bundles_post_ra>
